<compile_context>
chip_gen: v7x
topology: tpu7x:2x2x1
jax: 0.10.0
libtpu: 0.0.40
codegen_flags: <defaults>
</compile_context>

<pallas_src>
import functools

import jax
import jax.numpy as jnp
import numpy as np
from jax import lax
from jax.experimental import pallas as pl
from jax.experimental.pallas import tpu as pltpu


def self_attn_kernel(x_ref, w_ref, gamma_ref, out_ref, att_ref, *, c, ckp, block_b):
    """One grid step: `block_b` batch elements, full (C, N) / (N, N) slabs."""
    gamma = gamma_ref[0, 0]                       # scalar from SMEM
    w = w_ref[...]                                # (ctot, C+1) f32, bias folded in

    for bb in range(block_b):                     # static unroll over the batch block
        x = x_ref[bb]                             # (C+1, N) f32; row C is the ones-row
        # Fused 1x1 convs (+ bias via ones-row): one MXU matmul -> [value; query; key].
        qkv = jnp.dot(w, x, preferred_element_type=jnp.float32)          # (ctot, N)
        v = qkv[:c, :]                            # (C,   N)
        q = qkv[c:c + ckp, :]                     # (ckp, N)  rows beyond ck are zero
        k = qkv[c + ckp:, :]                      # (ckp, N)  rows beyond ck are zero

        # energy[i, j] = sum_c q[c, i] * k[c, j]: contract the channel axis directly
        # (no lane-sparse q.T).  Zero-padded q/k rows contribute nothing.
        energy = lax.dot_general(q, k, (((0,), (0,)), ((), ())),
                                 preferred_element_type=jnp.float32)     # (N, N)

        # Numerically-stable softmax; divide -> EUP reciprocal + VPU multiply.
        m = jnp.max(energy, axis=-1, keepdims=True)
        e = jnp.exp(energy - m)
        inv = pl.reciprocal(jnp.sum(e, axis=-1, keepdims=True), approx=True)
        att = e * inv                                                     # (N, N) f32

        # out[c, i] = sum_j v[c, j] * att[i, j]: bf16 MXU operands, f32 accumulation.
        out = lax.dot_general(v.astype(jnp.bfloat16), att.astype(jnp.bfloat16),
                              (((1,), (1,)), ((), ())),
                              preferred_element_type=jnp.float32)         # (C, N)
        out = gamma * out + x[:c, :]

        out_ref[bb] = out.astype(out_ref.dtype)
        att_ref[bb] = att.astype(att_ref.dtype)


def _pick_block_b(batch):
    """Largest divisor of `batch` that still leaves >= 2 grid steps (v7x 2-TC)."""
    target = max(1, min(4, batch // 2))
    for bb in range(target, 0, -1):
        if batch % bb == 0:
            return bb
    return 1


def self_attn(x, params):
    B, C, W, H = x.shape
    N = W * H
    ck = params["wq"].shape[0]
    ckp = max(8, ((ck + 7) // 8) * 8)             # pad q/k rows to a sublane multiple
    ctot = C + 2 * ckp
    cp1 = C + 1
    block_b = _pick_block_b(B)

    # Lane-dense layout: flatten spatial dims (free view-reshape on NCHW), then
    # append a ones-row so the biases fold into the fused weight matmul.
    x_flat = x.reshape(B, C, N).astype(jnp.float32)
    x_aug = jnp.concatenate([x_flat, jnp.ones((B, 1, N), jnp.float32)], axis=1)

    def pad_rows(w):
        return jnp.pad(w, ((0, ckp - w.shape[0]), (0, 0)))

    w_stack = jnp.concatenate([params["wv"], pad_rows(params["wq"]),
                               pad_rows(params["wk"])], axis=0)           # (ctot, C)
    b_stack = jnp.concatenate([params["bv"],
                               jnp.pad(params["bq"], (0, ckp - ck)),
                               jnp.pad(params["bk"], (0, ckp - ck))]).reshape(ctot, 1)
    w_aug = jnp.concatenate([w_stack, b_stack], axis=1).astype(jnp.float32)  # (ctot, C+1)
    gamma = jnp.asarray(params["gamma"], jnp.float32).reshape(1, 1)

    flops = 2 * B * (ctot * cp1 * N + ckp * N * N + C * N * N)
    bytes_accessed = 4 * (B * cp1 * N + B * C * N + B * N * N + ctot * cp1 + 1)
    cost = pl.CostEstimate(flops=flops, transcendentals=B * N * N,
                           bytes_accessed=bytes_accessed)

    kernel = functools.partial(self_attn_kernel, c=C, ckp=ckp, block_b=block_b)

    grid_spec = pltpu.PrefetchScalarGridSpec(
        num_scalar_prefetch=0,
        grid=(B // block_b,),
        in_specs=[
            pl.BlockSpec((block_b, cp1, N), lambda b: (b, 0, 0)),   # x (+ ones-row)
            pl.BlockSpec((ctot, cp1), lambda b: (0, 0)),            # fused qkv weight
            pl.BlockSpec(memory_space=pltpu.MemorySpace.SMEM),      # gamma scalar
        ],
        out_specs=[
            pl.BlockSpec((block_b, C, N), lambda b: (b, 0, 0)),     # out (lane-dense)
            pl.BlockSpec((block_b, N, N), lambda b: (b, 0, 0)),     # attention
        ],
    )

    out_flat, att = pl.pallas_call(
        kernel,
        out_shape=(
            jax.ShapeDtypeStruct((B, C, N), x.dtype),
            jax.ShapeDtypeStruct((B, N, N), x.dtype),
        ),
        grid_spec=grid_spec,
        compiler_params=pltpu.CompilerParams(
            dimension_semantics=("parallel",),
            vmem_limit_bytes=32 * 1024 * 1024,
        ),
        cost_estimate=cost,
    )(x_aug, w_aug, gamma)

    # Match PyTorch return signature: (out, attention)
    return out_flat.reshape(B, C, W, H), att


def init_params(key, in_dim):
    ck = in_dim // 8
    ks = jax.random.split(key, 6)
    f32 = jnp.float32
    return {
        "wq": jax.random.normal(ks[0], (ck, in_dim), f32) * 0.1,
        "bq": jax.random.normal(ks[1], (ck,), f32) * 0.02,
        "wk": jax.random.normal(ks[2], (ck, in_dim), f32) * 0.1,
        "bk": jax.random.normal(ks[3], (ck,), f32) * 0.02,
        "wv": jax.random.normal(ks[4], (in_dim, in_dim), f32) * 0.1,
        "bv": jax.random.normal(ks[5], (in_dim,), f32) * 0.02,
        # PyTorch initializes gamma to 0; a nonzero value exercises the residual
        # gating path in the numerical check (forward semantics are identical).
        "gamma": jnp.float32(0.75),
    }


def reference_forward(x, p):
    """Pure-JAX f32 reference mirroring the PyTorch Self_Attn.forward."""
    B, C, W, H = x.shape
    N = W * H
    hi = lax.Precision.HIGHEST
    xf = x.reshape(B, C, N)
    q = jnp.einsum("oc,bcn->bon", p["wq"], xf, precision=hi) + p["bq"][None, :, None]
    k = jnp.einsum("oc,bcn->bon", p["wk"], xf, precision=hi) + p["bk"][None, :, None]
    v = jnp.einsum("oc,bcn->bon", p["wv"], xf, precision=hi) + p["bv"][None, :, None]
    energy = jnp.einsum("bci,bcj->bij", q, k, precision=hi)
    att = jax.nn.softmax(energy, axis=-1)
    out = jnp.einsum("bcj,bij->bci", v, att, precision=hi)
    out = p["gamma"] * out + xf
    return out.reshape(B, C, W, H), att


if __name__ == "__main__":
    key = jax.random.PRNGKey(0)
    kx, kp = jax.random.split(key)

    # in_dim must be >= 8 so that in_dim // 8 >= 1 (as the module requires).
    B, C, W, H = 2, 16, 16, 16
    x = jax.random.normal(kx, (B, C, W, H), jnp.float32)
    params = init_params(kp, in_dim=C)

    out, att = self_attn(x, params)
    out = jax.block_until_ready(out)
    att = jax.block_until_ready(att)

    out_ref, att_ref = reference_forward(x, params)
    # att: f32 throughout except the approx reciprocal (~2e-4 relative).
    np.testing.assert_allclose(np.asarray(att), np.asarray(att_ref),
                               rtol=1e-2, atol=2e-4)
    # out: bf16 MXU operands in the PV matmul (f32 accumulation).
    np.testing.assert_allclose(np.asarray(out), np.asarray(out_ref),
                               rtol=2e-2, atol=5e-3)
    assert out.shape == (B, C, W, H)
    assert att.shape == (B, W * H, W * H)

    print("KERNEL_OK")
</pallas_src>

<mosaic_0001>
module attributes {stable_mosaic.version = 11 : i64} {
  func.func @self_attn_kernel(%arg0: i32, %arg1: memref<1x17x256xf32, #tpu.memory_space<vmem>>, %arg2: memref<32x17xf32, #tpu.memory_space<vmem>>, %arg3: memref<1x1xf32, #tpu.memory_space<smem>>, %arg4: memref<1x16x256xf32, #tpu.memory_space<vmem>>, %arg5: memref<1x256x256xf32, #tpu.memory_space<vmem>>) attributes {dimension_semantics = [#tpu.dimension_semantics<parallel>], iteration_bounds = array<i64: 2>, scalar_prefetch = 0 : i64, scratch_operands = 0 : i64, tpu.core_type = #tpu.core_type<tc>, window_params = [{transform_indices = @transform_0, window_bounds = array<i64: 1, 17, 256>}, {pipeline_mode = #tpu.pipeline_mode<synchronous>, transform_indices = @transform_1, window_bounds = array<i64: 32, 17>}, {transform_indices = @transform_2, window_bounds = array<i64: 1, 1>}, {transform_indices = @transform_3, window_bounds = array<i64: 1, 16, 256>}, {transform_indices = @transform_4, window_bounds = array<i64: 1, 256, 256>}]} {
    %c0 = arith.constant 0 : index
    %c0_0 = arith.constant 0 : index
    %0 = memref.load %arg3[%c0, %c0_0] : memref<1x1xf32, #tpu.memory_space<smem>>
    %c0_1 = arith.constant 0 : index
    %c0_2 = arith.constant 0 : index
    %1 = vector.load %arg2[%c0_1, %c0_2] : memref<32x17xf32, #tpu.memory_space<vmem>>, vector<32x17xf32>
    %c0_3 = arith.constant 0 : index
    %c0_4 = arith.constant 0 : index
    %c0_5 = arith.constant 0 : index
    %2 = vector.load %arg1[%c0_3, %c0_4, %c0_5] : memref<1x17x256xf32, #tpu.memory_space<vmem>>, vector<1x17x256xf32>
    %3 = vector.shape_cast %2 : vector<1x17x256xf32> to vector<17x256xf32>
    %cst = arith.constant dense<0.000000e+00> : vector<32x256xf32>
    %4 = tpu.matmul %1, %3, %cst {dimension_numbers = #tpu.dot_dimension_numbers<[1], [0], [0], [1], [0, 0, 1, 1], [], []>} : vector<32x17xf32>, vector<17x256xf32>, vector<32x256xf32> -> vector<32x256xf32>
    %5 = vector.extract_strided_slice %4 {offsets = [0, 0], sizes = [16, 256], strides = [1, 1]} : vector<32x256xf32> to vector<16x256xf32>
    %6 = vector.extract_strided_slice %4 {offsets = [16, 0], sizes = [8, 256], strides = [1, 1]} : vector<32x256xf32> to vector<8x256xf32>
    %7 = vector.extract_strided_slice %4 {offsets = [24, 0], sizes = [8, 256], strides = [1, 1]} : vector<32x256xf32> to vector<8x256xf32>
    %cst_6 = arith.constant dense<0.000000e+00> : vector<256x256xf32>
    %8 = tpu.matmul %6, %7, %cst_6 {dimension_numbers = #tpu.dot_dimension_numbers<[0], [0], [1], [1], [0, 1, 1, 1], [], []>} : vector<8x256xf32>, vector<8x256xf32>, vector<256x256xf32> -> vector<256x256xf32>
    %cst_7 = arith.constant dense<0xFF800000> : vector<256xf32>
    %9 = vector.multi_reduction <maximumf>, %8, %cst_7 [1] : vector<256x256xf32> to vector<256xf32>
    %10 = vector.shape_cast %9 : vector<256xf32> to vector<256x1xf32>
    %11 = vector.broadcast %10 : vector<256x1xf32> to vector<256x256xf32>
    %12 = arith.subf %8, %11 : vector<256x256xf32>
    %13 = math.exp %12 : vector<256x256xf32>
    %cst_8 = arith.constant dense<0.000000e+00> : vector<256xf32>
    %14 = vector.multi_reduction <add>, %13, %cst_8 [1] : vector<256x256xf32> to vector<256xf32>
    %15 = vector.shape_cast %14 : vector<256xf32> to vector<256x1xf32>
    %16 = tpu.reciprocal %15 {approx = true} : vector<256x1xf32> -> vector<256x1xf32>
    %17 = vector.broadcast %16 : vector<256x1xf32> to vector<256x256xf32>
    %18 = arith.mulf %13, %17 : vector<256x256xf32>
    %19 = arith.truncf %5 : vector<16x256xf32> to vector<16x256xbf16>
    %20 = arith.truncf %18 : vector<256x256xf32> to vector<256x256xbf16>
    %cst_9 = arith.constant dense<0.000000e+00> : vector<16x256xf32>
    %21 = tpu.matmul %19, %20, %cst_9 {dimension_numbers = #tpu.dot_dimension_numbers<[1], [1], [0], [0], [0, 0, 1, 0], [], []>} : vector<16x256xbf16>, vector<256x256xbf16>, vector<16x256xf32> -> vector<16x256xf32>
    %22 = vector.broadcast %0 : f32 to vector<16x256xf32>
    %23 = arith.mulf %22, %21 : vector<16x256xf32>
    %24 = vector.extract_strided_slice %3 {offsets = [0, 0], sizes = [16, 256], strides = [1, 1]} : vector<17x256xf32> to vector<16x256xf32>
    %25 = arith.addf %23, %24 : vector<16x256xf32>
    %c0_10 = arith.constant 0 : index
    %c0_11 = arith.constant 0 : index
    %c0_12 = arith.constant 0 : index
    %26 = vector.load %arg4[%c0_10, %c0_11, %c0_12] : memref<1x16x256xf32, #tpu.memory_space<vmem>>, vector<1x16x256xf32>
    %27 = vector.shape_cast %26 : vector<1x16x256xf32> to vector<16x256xf32>
    %28 = vector.shape_cast %25 : vector<16x256xf32> to vector<1x16x256xf32>
    tpu.vector_store %arg4[%c0_10, %c0_11, %c0_12], %28 {strides = array<i32>} : memref<1x16x256xf32, #tpu.memory_space<vmem>>, vector<1x16x256xf32>,
    %c0_13 = arith.constant 0 : index
    %c0_14 = arith.constant 0 : index
    %c0_15 = arith.constant 0 : index
    %29 = vector.load %arg5[%c0_13, %c0_14, %c0_15] : memref<1x256x256xf32, #tpu.memory_space<vmem>>, vector<1x256x256xf32>
    %30 = vector.shape_cast %29 : vector<1x256x256xf32> to vector<256x256xf32>
    %31 = vector.shape_cast %18 : vector<256x256xf32> to vector<1x256x256xf32>
    tpu.vector_store %arg5[%c0_13, %c0_14, %c0_15], %31 {strides = array<i32>} : memref<1x256x256xf32, #tpu.memory_space<vmem>>, vector<1x256x256xf32>,
    return
  }
  func.func @transform_0(%arg0: i32) -> (i32, i32, i32) {
    %c0_i32 = arith.constant 0 : i32
    %c0_i32_0 = arith.constant 0 : i32
    %c0_i32_1 = arith.constant 0 : i32
    return %arg0, %c0_i32, %c0_i32_0 : i32, i32, i32
  }
  func.func @transform_1(%arg0: i32) -> (i32, i32) {
    %c0_i32 = arith.constant 0 : i32
    %c0_i32_0 = arith.constant 0 : i32
    %c0_i32_1 = arith.constant 0 : i32
    return %c0_i32, %c0_i32_0 : i32, i32
  }
  func.func @transform_2(%arg0: i32) -> (i32, i32) {
    %c0_i32 = arith.constant 0 : i32
    %c0_i32_0 = arith.constant 0 : i32
    %c0_i32_1 = arith.constant 0 : i32
    return %c0_i32, %c0_i32_0 : i32, i32
  }
  func.func @transform_3(%arg0: i32) -> (i32, i32, i32) {
    %c0_i32 = arith.constant 0 : i32
    %c0_i32_0 = arith.constant 0 : i32
    %c0_i32_1 = arith.constant 0 : i32
    return %arg0, %c0_i32, %c0_i32_0 : i32, i32, i32
  }
  func.func @transform_4(%arg0: i32) -> (i32, i32, i32) {
    %c0_i32 = arith.constant 0 : i32
    %c0_i32_0 = arith.constant 0 : i32
    %c0_i32_1 = arith.constant 0 : i32
    return %arg0, %c0_i32, %c0_i32_0 : i32, i32, i32
  }
}

</mosaic_0001>

<bundles_post_ra>
// kernel: tpu_custom_call.1
= control target key start
LH: loop header
LB: loop body
LE: loop exit
PB: predicated region body
PF: predicated region fallthrough
CT: control target
= control target key end

     0   :  { %s2775_s0 = inlined_call_operand.vmem [shape: f32[2,17,256], index: 0, kind: input, shape index: {}]   ;;  %s2776_s1 = inlined_call_operand.vmem [shape: f32[32,17], index: 1, kind: input, shape index: {}]   ;;  %s2777_s2 = inlined_call_operand.<no memory space> [shape: f32[1,1], index: 2, kind: input, shape index: {}]   ;;  %s2778_s3 = inlined_call_operand.hbm [shape: f32[2,16,256], index: 3, kind: output, shape index: {0}]   ;;  %s2779_s4 = inlined_call_operand.hbm [shape: f32[2,256,256], index: 4, kind: output, shape index: {1}]  }
   0x1   :  { %10 = sst [smem:[#allocation2]] %s2777_s2 }
   0x2   :  { %11 = vsyncpa [#allocation4], 0 }
   0x3   :  { %13 = vsyncpa [#allocation4 + $0x1], 0 }
   0x4   :  { %14 = vsyncpa [#allocation6], 0 }
   0x5   :  { %16 = vsyncpa [#allocation6 + $0x1], 0  ;;  %s1941_s17 = smov 0   ;;  %s1943_s18 = smov 0  }
   0x6   :  { %s1945_s19 = smov 0   ;;  %s1947_s20 = smov 0  }
   0x7 LB: > { %s1962_s2 = sadd.s32 4294967295, %s1906_s20   ;;  %s1509_s21 = sadd.s32 4294967294, %s1906_s20   ;;  %s1906_s20 = sphi %s1947_s20, %s2861_s20   ;;  %s1902_s19 = sphi %s1945_s19, %s2860_s19   ;;  %s1898_s18 = sphi %s1943_s18, %s2859_s18   ;;  %s1894_s17 = sphi %s1941_s17, %s2858_s17  }
   0x8   : > { %s1966_s22 = sadd.s32 1, %s1906_s20   ;;  %s97_s23 = sadd.s32 1, %s1902_s19 }
   0x9   : > { %s94_s24 = ssub.s32 %s1906_s20, %s1966_s22  ;;  %p107_p0 = scmp.ne.s32.totalorder %s1902_s19, %s1898_s18 }
   0xa   : > { %p95_p1 = scmp.eq.s32.totalorder %s94_s24, 0  ;;  %p108_p2 = scmp.eq.s32.totalorder %s1962_s2, 1 }
   0xb   : > { %p113_p3 = scmp.ne.s32.totalorder %s1898_s18, %s1894_s17  ;;  %p114_p4 = scmp.eq.s32.totalorder %s1509_s21, 1 }
   0xc   : > { %s1977_s25 = scalar_select %p95_p1, %s1902_s19, %s97_s23  }
   0xd   : > { %p1979_p5 = por %p108_p2, %p107_p0  ;;  %p1983_p6 = por %p114_p4, %p113_p3 }
   0xe   : > { %p1512_p7 = scmp.ge.s32.totalorder %s1906_s20, 1  ;;  %p172_p8 = scmp.lt.s32.totalorder %s1906_s20, 3 }
  0x10   : > { %p173_p9 = pnand %p1512_p7, %p172_p8 }
  0x12   : > { %176 = sbr.rel (%p173_p9) target bundleno = 1287 (0x507), region = 32 }
  0x19   : > { %p203_p10 = scmp.lt.s32.totalorder %s1962_s2, 1  ;;  %v1908_v0 = vmov 0.0   ;;  %vm232_vm0 = vcmask 1040384   ;;  %v209_v9 = vld [vmem:[%s2776_s1] sm:$0xff]  ;;  %vm219_vm1 = vcmask 138240   ;;  %v210_v10 = vld [vmem:[%s2776_s1 + $0x8] sm:$0xff] }
  0x1a   : > { %303 = vmatprep.mubr.f32.mxu0 %v1908_v0  ;;  %553 = vmatprep.mubr.f32.mxu1 %v1908_v0  ;;  %v211_v11 = vld [vmem:[%s2776_s1 + $0x10] sm:$0xff]  ;;  %v212_v12 = vld [vmem:[%s2776_s1 + $0x18] sm:$0xff]  ;;  %vm392_vm2 = vcmask 64512   ;;  %s2546_s15 = sand.u32 1, %s1898_s18   ;;  %s1563_s23 = sshll.u32 %s1962_s2, 13 }
  0x1b   : > { %s204_s28 = scalar_select %p203_p10, %s1962_s2, 1 }
  0x1c   : > { %s1514_s16 = sshll.u32 %s2546_s15, 9  ;;  %s1386_s5 = scalar_lea.sflag [#allocation6], %s2546_s15 }
  0x1d   : > { %s1568_s29 = smul.u32 48, %s204_s28  ;;  %s2551_s21 = scalar_lea.vmem [#allocation5], %s1514_s16 }
  0x1e   : > { %s1415_s30 = sshll.u32 %s2551_s21, 4  ;;  %s1909_s8 = smov [#allocation5]   ;;  %s2689_s30 = int_to_ptr.vmem [resolvable:$true] %s1415_s30 }
  0x1f   : > { %s1996_s6 = scalar_lea.vmem %s2775_s0, %s1568_s29  ;;  %s2686_s29 = scalar_lea.hbm %s2779_s4, %s1563_s23 }
  0x20   : > { %v214_v1 = vld [vmem:[%s1996_s6 + $0x8] sm:$0xff]  ;;  %v216_v2 = vld [vmem:[%s1996_s6 + $0x18] sm:$0xff]  ;;  %v213_v3 = vld [vmem:[%s1996_s6] sm:$0xff]  ;;  %s1812_s7 = scalar_lea.vmem %s2689_s30, 8192  ;;  %s1816_s9 = sshll.u32 %s1909_s8, 4  ;;  %s1817_s9 = int_to_ptr.vmem [resolvable:$false] %s1816_s9 }
  0x21   : > { %v1564_v4 = vpack.c.bf16 %v216_v2, %v214_v1  ;;  %v215_v5 = vld [vmem:[%s1996_s6 + $0x10] sm:$0xff]  ;;  %v218_v7 = vld [vmem:[%s1996_s6 + $0x28] sm:$0x1]  ;;  %v217_v8 = vld [vmem:[%s1996_s6 + $0x20] sm:$0x1]  ;;  %p1813_p11 = scmp.ne.s32.totalorder %s2689_s30, %s1812_s7  ;;  %s1818_s10 = scalar_lea.vmem %s1817_s9, 16384 }
  0x22   : > { %v1566_v6 = vpack.c.bf16 %v215_v5, %v213_v3  ;;  %p1819_p0 = scmp.lt.s32.totalorder %s2689_s30, %s1817_s9  ;;  %p1820_p1 = scmp.lt.s32.totalorder %s1818_s10, %s1812_s7 }
  0x23   : > { %1565 = vmatprep.subr.bf16.mxu0 %v1564_v4  ;;  %p1814_p12 = pnand %p1813_p11, %p1979_p5 }
  0x24   : > { %1567 = vmatpush1.bf16.msra.mxu0 %v1566_v6  ;;  %p1821_p2 = por %p1820_p1, %p1819_p0 }
  0x25   : > { %1516 = vmatprep.subr.msk.mxu0 %vm232_vm0, %v218_v7  ;;  %p1815_p13 = pneg %p1814_p12 }
  0x27   : > { %p1822_p3 = pnand %p1821_p2, %p1815_p13 }
  0x28   : > { %1517 = vmatpush1.msk.msra.mxu0 %vm232_vm0, %v217_v8 }
  0x29   : > { %1518 = vmatmul.mubr.msk.f32.vlgmr.msra.gmra.mrb[0].mxu0 %vm219_vm1, %v209_v9 }
  0x2a   : > { %309 = vmatprep.mubr.f32.mxu0 %v1908_v0 }
  0x2d   : > { %1519 = vmatmul.mubr.msk.f32.gmra.mrb[2].mxu0 %vm219_vm1, %v210_v10 }
  0x2e   : > { %315 = vmatprep.mubr.f32.mxu0 %v1908_v0 }
  0x31   : > { %1520 = vmatmul.mubr.msk.f32.gmra.mrb[4].mxu0 %vm219_vm1, %v211_v11 }
  0x32   : > { %321 = vmatprep.mubr.f32.mxu0 %v1908_v0 }
  0x35   : > { %1521 = vmatmul.mubr.msk.f32.gmra.mrb[6].mxu0 %vm219_vm1, %v212_v12 }
  0xfc   : > { %v2019_v13 = vpop.f32.mrb[0].mxu0 }
  0xfd   : > { %2807 = vst [vmem:[#allocation9_spill] sm:$0xff] %v2019_v13  ;;  %v2021_v14 = vpop.f32.mrb[1].mxu0 }
 0x100   : > { %v2023_v15 = vpop.f32.mrb[2].mxu0 }
 0x101   : > { %2808 = vst [vmem:[#allocation10_spill] sm:$0xff] %v2023_v15  ;;  %v2027_v17 = vpop.f32.mrb[3].mxu0 }
 0x102   : > { %v1227_v18 = vpack.c.bf16 %v2027_v17, %v2021_v14 }
 0x104   : > { %v317_v19 = vpop.f32.mrb[4].mxu0 }
 0x105   : > { %328 = vxpose.xlu0.b32.start.end [1/1] (short) %v317_v19, 128  ;;  %v319_v20 = vpop.f32.mrb[5].mxu0 }
 0x108   : > { %v323_v21 = vpop.f32.mrb[6].mxu0 }
 0x109   : > { %v325_v22 = vpop.f32.mrb[7].mxu0 }
 0x10a   : > { %489 = vmatprep.subr.mxu1 %v325_v22 }
 0x10b   : > { %490 = vmatpush1.msra.mxu1 %v323_v21 }
 0x142   : > { %360 = vxpose.xlu0.b32.start.end [1/1] (short) %v319_v20, 128 }
 0x185   : > { %v344_v23 = vpop.trf.xlu0 }
 0x186   : > { %1522 = vmatmul.mubr.msk.f32.vlgmr.msra.gmra.mrb[0].mxu1 %vm392_vm2, %v344_v23 }
 0x187   : > { %559 = vmatprep.mubr.f32.mxu1 %v1908_v0 }
 0x189   : > { %v345_v24 = vpop.trf.xlu0 }
 0x18a   : > { %1523 = vmatmul.mubr.msk.f32.gmra.mrb[2].mxu1 %vm392_vm2, %v345_v24 }
 0x18b   : > { %565 = vmatprep.mubr.f32.mxu1 %v1908_v0 }
 0x18d   : > { %v346_v25 = vpop.trf.xlu0 }
 0x18e   : > { %1524 = vmatmul.mubr.msk.f32.gmra.mrb[4].mxu1 %vm392_vm2, %v346_v25 }
 0x18f   : > { %571 = vmatprep.mubr.f32.mxu1 %v1908_v0 }
 0x191   : > { %v347_v26 = vpop.trf.xlu0 }
 0x192   : > { %1525 = vmatmul.mubr.msk.f32.gmra.mrb[6].mxu1 %vm392_vm2, %v347_v26 }
 0x193   : > { %577 = vmatprep.mubr.f32.mxu1 %v1908_v0 }
 0x195   : > { %v348_v27 = vpop.trf.xlu0 }
 0x196   : > { %1526 = vmatmul.mubr.msk.f32.gmra.mrb[8].mxu1 %vm392_vm2, %v348_v27 }
 0x197   : > { %583 = vmatprep.mubr.f32.mxu1 %v1908_v0 }
 0x199   : > { %v349_v28 = vpop.trf.xlu0 }
 0x19a   : > { %1527 = vmatmul.mubr.msk.f32.gmra.mrb[10].mxu1 %vm392_vm2, %v349_v28 }
 0x19b   : > { %589 = vmatprep.mubr.f32.mxu1 %v1908_v0 }
 0x19d   : > { %v350_v29 = vpop.trf.xlu0 }
 0x19e   : > { %1528 = vmatmul.mubr.msk.f32.gmra.mrb[12].mxu1 %vm392_vm2, %v350_v29 }
 0x19f   : > { %595 = vmatprep.mubr.f32.mxu1 %v1908_v0 }
 0x1a1   : > { %v351_v30 = vpop.trf.xlu0 }
 0x1a2   : > { %1529 = vmatmul.mubr.msk.f32.gmra.mrb[14].mxu1 %vm392_vm2, %v351_v30 }
 0x1a3   : > { %601 = vmatprep.mubr.f32.mxu1 %v1908_v0 }
 0x1a5   : > { %v352_v31 = vpop.trf.xlu0 }
 0x1a6   : > { %1530 = vmatmul.mubr.msk.f32.gmra.mrb[16].mxu1 %vm392_vm2, %v352_v31 }
 0x1a7   : > { %607 = vmatprep.mubr.f32.mxu1 %v1908_v0 }
 0x1a9   : > { %v353_v32 = vpop.trf.xlu0 }
 0x1aa   : > { %1531 = vmatmul.mubr.msk.f32.gmra.mrb[18].mxu1 %vm392_vm2, %v353_v32 }
 0x1ab   : > { %613 = vmatprep.mubr.f32.mxu1 %v1908_v0 }
 0x1ad   : > { %v354_v33 = vpop.trf.xlu0 }
 0x1ae   : > { %1532 = vmatmul.mubr.msk.f32.gmra.mrb[20].mxu1 %vm392_vm2, %v354_v33 }
 0x1af   : > { %619 = vmatprep.mubr.f32.mxu1 %v1908_v0 }
 0x1b1   : > { %v355_v34 = vpop.trf.xlu0 }
 0x1b2   : > { %1533 = vmatmul.mubr.msk.f32.gmra.mrb[22].mxu1 %vm392_vm2, %v355_v34 }
 0x1b3   : > { %625 = vmatprep.mubr.f32.mxu1 %v1908_v0 }
 0x1b5   : > { %v356_v35 = vpop.trf.xlu0 }
 0x1b6   : > { %1534 = vmatmul.mubr.msk.f32.gmra.mrb[24].mxu1 %vm392_vm2, %v356_v35 }
 0x1b7   : > { %631 = vmatprep.mubr.f32.mxu1 %v1908_v0 }
 0x1b9   : > { %v357_v36 = vpop.trf.xlu0 }
 0x1ba   : > { %1535 = vmatmul.mubr.msk.f32.gmra.mrb[26].mxu1 %vm392_vm2, %v357_v36 }
 0x1bb   : > { %637 = vmatprep.mubr.f32.mxu1 %v1908_v0 }
 0x1bd   : > { %v358_v37 = vpop.trf.xlu0 }
 0x1be   : > { %1536 = vmatmul.mubr.msk.f32.gmra.mrb[28].mxu1 %vm392_vm2, %v358_v37 }
 0x1bf   : > { %643 = vmatprep.mubr.f32.mxu1 %v1908_v0 }
 0x1c1   : > { %v359_v38 = vpop.trf.xlu0 }
 0x1c2   : > { %1537 = vmatmul.mubr.msk.f32.gmra.mrb[30].mxu1 %vm392_vm2, %v359_v38 }
 0x1c3   : > { %649 = vmatprep.mubr.f32.mxu1 %v1908_v0 }
 0x1c5   : > { %v376_v39 = vpop.trf.xlu0 }
 0x1c6   : > { %1538 = vmatmul.mubr.msk.f32.gmra.mrb[32].mxu1 %vm392_vm2, %v376_v39 }
 0x1c7   : > { %655 = vmatprep.mubr.f32.mxu1 %v1908_v0 }
 0x1c9   : > { %v377_v40 = vpop.trf.xlu0 }
 0x1ca   : > { %1539 = vmatmul.mubr.msk.f32.gmra.mrb[34].mxu1 %vm392_vm2, %v377_v40 }
 0x1cb   : > { %661 = vmatprep.mubr.f32.mxu1 %v1908_v0 }
 0x1cd   : > { %v378_v41 = vpop.trf.xlu0 }
 0x1ce   : > { %1540 = vmatmul.mubr.msk.f32.gmra.mrb[36].mxu1 %vm392_vm2, %v378_v41 }
 0x1cf   : > { %667 = vmatprep.mubr.f32.mxu1 %v1908_v0 }
 0x1d1   : > { %v379_v42 = vpop.trf.xlu0 }
 0x1d2   : > { %1541 = vmatmul.mubr.msk.f32.gmra.mrb[38].mxu1 %vm392_vm2, %v379_v42 }
 0x1d3   : > { %673 = vmatprep.mubr.f32.mxu1 %v1908_v0 }
 0x1d5   : > { %v380_v43 = vpop.trf.xlu0 }
 0x1d6   : > { %1542 = vmatmul.mubr.msk.f32.gmra.mrb[40].mxu1 %vm392_vm2, %v380_v43 }
 0x1d7   : > { %679 = vmatprep.mubr.f32.mxu1 %v1908_v0 }
 0x1d9   : > { %v381_v44 = vpop.trf.xlu0 }
 0x1da   : > { %1543 = vmatmul.mubr.msk.f32.gmra.mrb[42].mxu1 %vm392_vm2, %v381_v44 }
 0x1db   : > { %685 = vmatprep.mubr.f32.mxu1 %v1908_v0 }
 0x1dd   : > { %v382_v45 = vpop.trf.xlu0 }
 0x1de   : > { %1544 = vmatmul.mubr.msk.f32.gmra.mrb[44].mxu1 %vm392_vm2, %v382_v45 }
 0x1df   : > { %691 = vmatprep.mubr.f32.mxu1 %v1908_v0 }
 0x1e1   : > { %v383_v46 = vpop.trf.xlu0 }
 0x1e2   : > { %1545 = vmatmul.mubr.msk.f32.gmra.mrb[46].mxu1 %vm392_vm2, %v383_v46 }
 0x1e3   : > { %697 = vmatprep.mubr.f32.mxu1 %v1908_v0 }
 0x1e5   : > { %v384_v47 = vpop.trf.xlu0 }
 0x1e6   : > { %1546 = vmatmul.mubr.msk.f32.gmra.mrb[48].mxu1 %vm392_vm2, %v384_v47 }
 0x1e7   : > { %703 = vmatprep.mubr.f32.mxu1 %v1908_v0 }
 0x1e9   : > { %v385_v48 = vpop.trf.xlu0 }
 0x1ea   : > { %1547 = vmatmul.mubr.msk.f32.gmra.mrb[50].mxu1 %vm392_vm2, %v385_v48 }
 0x1eb   : > { %709 = vmatprep.mubr.f32.mxu1 %v1908_v0 }
 0x1ed   : > { %v386_v49 = vpop.trf.xlu0 }
 0x1ee   : > { %1548 = vmatmul.mubr.msk.f32.gmra.mrb[52].mxu1 %vm392_vm2, %v386_v49 }
 0x1ef   : > { %715 = vmatprep.mubr.f32.mxu1 %v1908_v0 }
 0x1f1   : > { %v387_v50 = vpop.trf.xlu0 }
 0x1f2   : > { %1549 = vmatmul.mubr.msk.f32.gmra.mrb[54].mxu1 %vm392_vm2, %v387_v50 }
 0x1f3   : > { %721 = vmatprep.mubr.f32.mxu1 %v1908_v0 }
 0x1f5   : > { %v388_v51 = vpop.trf.xlu0 }
 0x1f6   : > { %1550 = vmatmul.mubr.msk.f32.gmra.mrb[56].mxu1 %vm392_vm2, %v388_v51 }
 0x1f7   : > { %727 = vmatprep.mubr.f32.mxu1 %v1908_v0 }
 0x1f9   : > { %v389_v52 = vpop.trf.xlu0 }
 0x1fa   : > { %1551 = vmatmul.mubr.msk.f32.gmra.mrb[58].mxu1 %vm392_vm2, %v389_v52 }
 0x1fb   : > { %733 = vmatprep.mubr.f32.mxu1 %v1908_v0 }
 0x1fd   : > { %v390_v53 = vpop.trf.xlu0 }
 0x1fe   : > { %1552 = vmatmul.mubr.msk.f32.gmra.mrb[60].mxu1 %vm392_vm2, %v390_v53 }
 0x1ff   : > { %739 = vmatprep.mubr.f32.mxu1 %v1908_v0 }
 0x201   : > { %v391_v54 = vpop.trf.xlu0 }
 0x202   : > { %1553 = vmatmul.mubr.msk.f32.gmra.mrb[62].mxu1 %vm392_vm2, %v391_v54 }
 0x203   : > { %1292 = vmatprep.mubr.bf16.mxu1 %v1227_v18 }
 0x259   : > { %v2097_v55 = vpop.f32.mrb[0].mxu1 }
 0x25a   : > { %v2099_v56 = vpop.f32.mrb[1].mxu1 }
 0x25b   : > { %v746_v57 = vmax.f32 %v2097_v55, %v2099_v56 }
 0x25d   : > { %747 = vmax.xlane.f32.xlu1 %v746_v57  ;;  %v2103_v58 = vpop.f32.mrb[2].mxu1 }
 0x25e   : > { %v2105_v59 = vpop.f32.mrb[3].mxu1 }
 0x25f   : > { %v749_v60 = vmax.f32 %v2103_v58, %v2105_v59 }
 0x261   : > { %750 = vmax.xlane.f32.xlu1 %v749_v60  ;;  %v2109_v61 = vpop.f32.mrb[4].mxu1 }
 0x262   : > { %v2111_v62 = vpop.f32.mrb[5].mxu1 }
 0x263   : > { %v752_v63 = vmax.f32 %v2109_v61, %v2111_v62 }
 0x265   : > { %753 = vmax.xlane.f32.xlu1 %v752_v63  ;;  %v2115_v0 = vpop.f32.mrb[6].mxu1 }
 0x266   : > { %v2117_v1 = vpop.f32.mrb[7].mxu1 }
 0x267   : > { %v755_v2 = vmax.f32 %v2115_v0, %v2117_v1 }
 0x269   : > { %756 = vmax.xlane.f32.xlu1 %v755_v2  ;;  %v2121_v3 = vpop.f32.mrb[8].mxu1 }
 0x26a   : > { %v2123_v4 = vpop.f32.mrb[9].mxu1 }
 0x26b   : > { %v758_v5 = vmax.f32 %v2121_v3, %v2123_v4 }
 0x26d   : > { %759 = vmax.xlane.f32.xlu1 %v758_v5  ;;  %v2127_v6 = vpop.f32.mrb[10].mxu1 }
 0x26e   : > { %v2129_v7 = vpop.f32.mrb[11].mxu1 }
 0x26f   : > { %v761_v8 = vmax.f32 %v2127_v6, %v2129_v7 }
 0x271   : > { %762 = vmax.xlane.f32.xlu1 %v761_v8  ;;  %v2133_v9 = vpop.f32.mrb[12].mxu1 }
 0x272   : > { %v2135_v10 = vpop.f32.mrb[13].mxu1 }
 0x273   : > { %v764_v11 = vmax.f32 %v2133_v9, %v2135_v10 }
 0x275   : > { %765 = vmax.xlane.f32.xlu1 %v764_v11  ;;  %v2139_v12 = vpop.f32.mrb[14].mxu1 }
 0x276   : > { %v2141_v14 = vpop.f32.mrb[15].mxu1 }
 0x277   : > { %v767_v17 = vmax.f32 %v2139_v12, %v2141_v14 }
 0x279   : > { %768 = vmax.xlane.f32.xlu1 %v767_v17  ;;  %v2145_v18 = vpop.f32.mrb[16].mxu1 }
 0x27a   : > { %v2147_v19 = vpop.f32.mrb[17].mxu1 }
 0x27b   : > { %v770_v20 = vmax.f32 %v2145_v18, %v2147_v19 }
 0x27d   : > { %771 = vmax.xlane.f32.xlu1 %v770_v20  ;;  %v2151_v21 = vpop.f32.mrb[18].mxu1 }
 0x27e   : > { %v2153_v22 = vpop.f32.mrb[19].mxu1 }
 0x27f   : > { %v773_v23 = vmax.f32 %v2151_v21, %v2153_v22 }
 0x281   : > { %774 = vmax.xlane.f32.xlu1 %v773_v23  ;;  %v2157_v24 = vpop.f32.mrb[20].mxu1 }
 0x282   : > { %v2159_v25 = vpop.f32.mrb[21].mxu1 }
 0x283   : > { %v776_v26 = vmax.f32 %v2157_v24, %v2159_v25 }
 0x285   : > { %777 = vmax.xlane.f32.xlu1 %v776_v26  ;;  %v2163_v27 = vpop.f32.mrb[22].mxu1 }
 0x286   : > { %v2165_v28 = vpop.f32.mrb[23].mxu1 }
 0x287   : > { %v779_v29 = vmax.f32 %v2163_v27, %v2165_v28 }
 0x289   : > { %780 = vmax.xlane.f32.xlu1 %v779_v29  ;;  %v2169_v30 = vpop.f32.mrb[24].mxu1 }
 0x28a   : > { %v2171_v31 = vpop.f32.mrb[25].mxu1 }
 0x28b   : > { %v782_v32 = vmax.f32 %v2169_v30, %v2171_v31 }
 0x28d   : > { %783 = vmax.xlane.f32.xlu1 %v782_v32  ;;  %v2175_v33 = vpop.f32.mrb[26].mxu1 }
 0x28e   : > { %v2177_v34 = vpop.f32.mrb[27].mxu1 }
 0x28f   : > { %v785_v35 = vmax.f32 %v2175_v33, %v2177_v34 }
 0x291   : > { %786 = vmax.xlane.f32.xlu1 %v785_v35  ;;  %v2181_v36 = vpop.f32.mrb[28].mxu1 }
 0x292   : > { %v2183_v37 = vpop.f32.mrb[29].mxu1 }
 0x293   : > { %v788_v38 = vmax.f32 %v2181_v36, %v2183_v37 }
 0x295   : > { %789 = vmax.xlane.f32.xlu1 %v788_v38  ;;  %v2187_v39 = vpop.f32.mrb[30].mxu1 }
 0x296   : > { %v2189_v40 = vpop.f32.mrb[31].mxu1 }
 0x297   : > { %v791_v41 = vmax.f32 %v2187_v39, %v2189_v40 }
 0x299   : > { %792 = vmax.xlane.f32.xlu1 %v791_v41  ;;  %v2193_v42 = vpop.f32.mrb[32].mxu1 }
 0x29a   : > { %v2195_v43 = vpop.f32.mrb[33].mxu1 }
 0x29b   : > { %v794_v44 = vmax.f32 %v2193_v42, %v2195_v43 }
 0x29d   : > { %795 = vmax.xlane.f32.xlu1 %v794_v44  ;;  %v2199_v45 = vpop.f32.mrb[34].mxu1 }
 0x29e   : > { %v2201_v46 = vpop.f32.mrb[35].mxu1 }
 0x29f   : > { %v797_v47 = vmax.f32 %v2199_v45, %v2201_v46 }
 0x2a1   : > { %798 = vmax.xlane.f32.xlu0 %v797_v47  ;;  %v2205_v48 = vpop.f32.mrb[36].mxu1 }
 0x2a2   : > { %v2207_v49 = vpop.f32.mrb[37].mxu1 }
 0x2a3   : > { %v800_v50 = vmax.f32 %v2205_v48, %v2207_v49 }
 0x2a5   : > { %801 = vmax.xlane.f32.xlu1 %v800_v50  ;;  %v2211_v51 = vpop.f32.mrb[38].mxu1 }
 0x2a6   : > { %v2213_v52 = vpop.f32.mrb[39].mxu1 }
 0x2a7   : > { %v803_v53 = vmax.f32 %v2211_v51, %v2213_v52 }
 0x2a9   : > { %804 = vmax.xlane.f32.xlu1 %v803_v53  ;;  %v2217_v54 = vpop.f32.mrb[40].mxu1 }
 0x2aa   : > { %v2219_v57 = vpop.f32.mrb[41].mxu1 }
 0x2ab   : > { %v806_v60 = vmax.f32 %v2217_v54, %v2219_v57 }
 0x2ad   : > { %807 = vmax.xlane.f32.xlu1 %v806_v60  ;;  %v2223_v63 = vpop.f32.mrb[42].mxu1 }
 0x2ae   : > { %v2225_v2 = vpop.f32.mrb[43].mxu1 }
 0x2af   : > { %v809_v5 = vmax.f32 %v2223_v63, %v2225_v2 }
 0x2b1   : > { %810 = vmax.xlane.f32.xlu1 %v809_v5  ;;  %v2229_v8 = vpop.f32.mrb[44].mxu1 }
 0x2b2   : > { %v2231_v11 = vpop.f32.mrb[45].mxu1 }
 0x2b3   : > { %v812_v17 = vmax.f32 %v2229_v8, %v2231_v11 }
 0x2b5   : > { %813 = vmax.xlane.f32.xlu1 %v812_v17  ;;  %v2235_v20 = vpop.f32.mrb[46].mxu1 }
 0x2b6   : > { %v2237_v23 = vpop.f32.mrb[47].mxu1 }
 0x2b7   : > { %v815_v26 = vmax.f32 %v2235_v20, %v2237_v23 }
 0x2b9   : > { %816 = vmax.xlane.f32.xlu1 %v815_v26  ;;  %v2241_v29 = vpop.f32.mrb[48].mxu1 }
 0x2ba   : > { %v2243_v32 = vpop.f32.mrb[49].mxu1 }
 0x2bb   : > { %v818_v35 = vmax.f32 %v2241_v29, %v2243_v32 }
 0x2bd   : > { %819 = vmax.xlane.f32.xlu1 %v818_v35  ;;  %v2247_v38 = vpop.f32.mrb[50].mxu1 }
 0x2be   : > { %2809 = vst [vmem:[#allocation11_spill] sm:$0xff] %v2247_v38  ;;  %v2249_v41 = vpop.f32.mrb[51].mxu1 }
 0x2bf   : > { %2810 = vst [vmem:[#allocation12_spill] sm:$0xff] %v2249_v41  ;;  %v821_v44 = vmax.f32 %v2247_v38, %v2249_v41 }
 0x2c1   : > { %822 = vmax.xlane.f32.xlu1 %v821_v44  ;;  %v2253_v47 = vpop.f32.mrb[52].mxu1 }
 0x2c2   : > { %2811 = vst [vmem:[#allocation13_spill] sm:$0xff] %v2253_v47  ;;  %v2255_v50 = vpop.f32.mrb[53].mxu1 }
 0x2c3   : > { %2812 = vst [vmem:[#allocation14_spill] sm:$0xff] %v2255_v50  ;;  %v824_v53 = vmax.f32 %v2253_v47, %v2255_v50 }
 0x2c5   : > { %825 = vmax.xlane.f32.xlu1 %v824_v53  ;;  %v2259_v60 = vpop.f32.mrb[54].mxu1 }
 0x2c6   : > { %2813 = vst [vmem:[#allocation15_spill] sm:$0xff] %v2259_v60  ;;  %v2261_v5 = vpop.f32.mrb[55].mxu1 }
 0x2c7   : > { %2814 = vst [vmem:[#allocation16_spill] sm:$0xff] %v2261_v5  ;;  %v827_v17 = vmax.f32 %v2259_v60, %v2261_v5 }
 0x2c9   : > { %828 = vmax.xlane.f32.xlu1 %v827_v17  ;;  %v2265_v26 = vpop.f32.mrb[56].mxu1 }
 0x2ca   : > { %2815 = vst [vmem:[#allocation17_spill] sm:$0xff] %v2265_v26  ;;  %v2267_v35 = vpop.f32.mrb[57].mxu1 }
 0x2cb   : > { %2816 = vst [vmem:[#allocation18_spill] sm:$0xff] %v2267_v35  ;;  %v830_v44 = vmax.f32 %v2265_v26, %v2267_v35 }
 0x2cd   : > { %831 = vmax.xlane.f32.xlu1 %v830_v44  ;;  %v2271_v16 = vpop.f32.mrb[58].mxu1 }
 0x2ce   : > { %2817 = vst [vmem:[#allocation19_spill] sm:$0xff] %v2271_v16  ;;  %v2273_v13 = vpop.f32.mrb[59].mxu1 }
 0x2cf   : > { %2818 = vst [vmem:[#allocation20_spill] sm:$0xff] %v2273_v13  ;;  %v833_v53 = vmax.f32 %v2271_v16, %v2273_v13 }
 0x2d1   : > { %834 = vmax.xlane.f32.xlu1 %v833_v53  ;;  %v2277_v15 = vpop.f32.mrb[60].mxu1 }
 0x2d2   : > { %2819 = vst [vmem:[#allocation21_spill] sm:$0xff] %v2277_v15  ;;  %v2279_v5 = vpop.f32.mrb[61].mxu1 }
 0x2d3   : > { %2820 = vst [vmem:[#allocation22_spill] sm:$0xff] %v2279_v5  ;;  %v836_v17 = vmax.f32 %v2277_v15, %v2279_v5 }
 0x2d5   : > { %837 = vmax.xlane.f32.xlu1 %v836_v17  ;;  %v2283_v60 = vpop.f32.mrb[62].mxu1 }
 0x2d6   : > { %v2285_v35 = vpop.f32.mrb[63].mxu1 }
 0x2d7   : > { %2821 = vst [vmem:[#allocation23_spill] sm:$0xff] %v2285_v35  ;;  %v839_v44 = vmax.f32 %v2283_v60, %v2285_v35 }
 0x2d9   : > { %840 = vmax.xlane.f32.xlu1 %v839_v44 }
 0x2ea   : > { %v748_v26 = vpop.xlane.xlu1 %747 }
 0x2eb   : > { %v842_v13 = vsub.f32 %v2097_v55, %v748_v26  ;;  %v843_v53 = vsub.f32 %v2099_v56, %v748_v26 }
 0x2ed   : > { %v906_v16 = vmul.f32 1.442695, %v842_v13  ;;  %v908_v50 = vmul.f32 1.442695, %v843_v53 }
 0x2ee   : > { %v751_v47 = vpop.xlane.xlu1 %750 }
 0x2ef   : > { %1616 = vpow2.f32 %v906_v16  ;;  %v844_v5 = vsub.f32 %v2103_v58, %v751_v47  ;;  %v845_v17 = vsub.f32 %v2105_v59, %v751_v47 }
 0x2f0   : > { %1618 = vpow2.f32 %v908_v50 }
 0x2f1   : > { %v910_v15 = vmul.f32 1.442695, %v844_v5  ;;  %v912_v41 = vmul.f32 1.442695, %v845_v17 }
 0x2f2   : > { %v754_v38 = vpop.xlane.xlu1 %753 }
 0x2f3   : > { %1620 = vpow2.f32 %v910_v15  ;;  %v846_v44 = vsub.f32 %v2109_v61, %v754_v38  ;;  %v847_v35 = vsub.f32 %v2111_v62, %v754_v38 }
 0x2f4   : > { %1622 = vpow2.f32 %v912_v41 }
 0x2f5   : > { %v914_v55 = vmul.f32 1.442695, %v846_v44  ;;  %v916_v56 = vmul.f32 1.442695, %v847_v35 }
 0x2f6   : > { %v757_v13 = vpop.xlane.xlu1 %756 }
 0x2f7   : > { %1624 = vpow2.f32 %v914_v55  ;;  %v848_v16 = vsub.f32 %v2115_v0, %v757_v13  ;;  %v849_v58 = vsub.f32 %v2117_v1, %v757_v13 }
 0x2f8   : > { %1626 = vpow2.f32 %v916_v56 }
 0x2f9   : > { %v2297_v59 = vpop.eup %1616  ;;  %v918_v47 = vmul.f32 1.442695, %v848_v16  ;;  %v920_v50 = vmul.f32 1.442695, %v849_v58 }
 0x2fa   : > { %v2299_v5 = vpop.eup %1618  ;;  %v760_v15 = vpop.xlane.xlu1 %759 }
 0x2fb   : > { %1628 = vpow2.f32 %v918_v47  ;;  %v850_v61 = vsub.f32 %v2121_v3, %v760_v15  ;;  %v851_v62 = vsub.f32 %v2123_v4, %v760_v15  ;;  %v1034_v38 = vadd.f32 %v2299_v5, %v2297_v59 }
 0x2fc   : > { %1630 = vpow2.f32 %v920_v50 }
 0x2fd   : > { %v2305_v0 = vpop.eup %1620  ;;  %v922_v1 = vmul.f32 1.442695, %v850_v61  ;;  %v924_v41 = vmul.f32 1.442695, %v851_v62  ;;  %1035 = vadd.xlane.f32.xlu1 %v1034_v38 }
 0x2fe   : > { %v2307_v26 = vpop.eup %1622  ;;  %v763_v35 = vpop.xlane.xlu1 %762 }
 0x2ff   : > { %1632 = vpow2.f32 %v922_v1  ;;  %v852_v53 = vsub.f32 %v2127_v6, %v763_v35  ;;  %v853_v17 = vsub.f32 %v2129_v7, %v763_v35  ;;  %v1037_v3 = vadd.f32 %v2307_v26, %v2305_v0 }
 0x300   : > { %1634 = vpow2.f32 %v924_v41 }
 0x301   : > { %v2313_v4 = vpop.eup %1624  ;;  %v926_v44 = vmul.f32 1.442695, %v852_v53  ;;  %v928_v55 = vmul.f32 1.442695, %v853_v17  ;;  %1038 = vadd.xlane.f32.xlu1 %v1037_v3 }
 0x302   : > { %v2315_v56 = vpop.eup %1626  ;;  %v766_v13 = vpop.xlane.xlu1 %765 }
 0x303   : > { %1636 = vpow2.f32 %v926_v44  ;;  %v854_v16 = vsub.f32 %v2133_v9, %v766_v13  ;;  %v855_v58 = vsub.f32 %v2135_v10, %v766_v13  ;;  %v1040_v6 = vadd.f32 %v2315_v56, %v2313_v4 }
 0x304   : > { %1638 = vpow2.f32 %v928_v55 }
 0x305   : > { %v2321_v7 = vpop.eup %1628  ;;  %v930_v47 = vmul.f32 1.442695, %v854_v16  ;;  %v932_v50 = vmul.f32 1.442695, %v855_v58  ;;  %1041 = vadd.xlane.f32.xlu1 %v1040_v6 }
 0x306   : > { %v2323_v15 = vpop.eup %1630  ;;  %v769_v61 = vpop.xlane.xlu1 %768 }
 0x307   : > { %1640 = vpow2.f32 %v930_v47  ;;  %v856_v62 = vsub.f32 %v2139_v12, %v769_v61  ;;  %v857_v38 = vsub.f32 %v2141_v14, %v769_v61  ;;  %v1043_v9 = vadd.f32 %v2323_v15, %v2321_v7 }
 0x308   : > { %1642 = vpow2.f32 %v932_v50 }
 0x309   : > { %v2329_v10 = vpop.eup %1632  ;;  %v934_v1 = vmul.f32 1.442695, %v856_v62  ;;  %v936_v41 = vmul.f32 1.442695, %v857_v38  ;;  %1044 = vadd.xlane.f32.xlu1 %v1043_v9 }
 0x30a   : > { %v2331_v35 = vpop.eup %1634  ;;  %v772_v53 = vpop.xlane.xlu1 %771 }
 0x30b   : > { %1644 = vpow2.f32 %v934_v1  ;;  %v858_v17 = vsub.f32 %v2145_v18, %v772_v53  ;;  %v859_v3 = vsub.f32 %v2147_v19, %v772_v53  ;;  %v1046_v12 = vadd.f32 %v2331_v35, %v2329_v10 }
 0x30c   : > { %1646 = vpow2.f32 %v936_v41 }
 0x30d   : > { %v2337_v14 = vpop.eup %1636  ;;  %v938_v44 = vmul.f32 1.442695, %v858_v17  ;;  %v940_v55 = vmul.f32 1.442695, %v859_v3  ;;  %1047 = vadd.xlane.f32.xlu1 %v1046_v12 }
 0x30e   : > { %v2339_v13 = vpop.eup %1638  ;;  %v775_v16 = vpop.xlane.xlu1 %774 }
 0x30f   : > { %1648 = vpow2.f32 %v938_v44  ;;  %v860_v58 = vsub.f32 %v2151_v21, %v775_v16  ;;  %v861_v6 = vsub.f32 %v2153_v22, %v775_v16  ;;  %v1049_v18 = vadd.f32 %v2339_v13, %v2337_v14 }
 0x310   : > { %1650 = vpow2.f32 %v940_v55 }
 0x311   : > { %v2345_v19 = vpop.eup %1640  ;;  %v942_v47 = vmul.f32 1.442695, %v860_v58  ;;  %v944_v50 = vmul.f32 1.442695, %v861_v6  ;;  %1050 = vadd.xlane.f32.xlu1 %v1049_v18 }
 0x312   : > { %v2347_v61 = vpop.eup %1642  ;;  %v778_v62 = vpop.xlane.xlu1 %777 }
 0x313   : > { %1652 = vpow2.f32 %v942_v47  ;;  %v862_v38 = vsub.f32 %v2157_v24, %v778_v62  ;;  %v863_v9 = vsub.f32 %v2159_v25, %v778_v62  ;;  %v1052_v21 = vadd.f32 %v2347_v61, %v2345_v19 }
 0x314   : > { %1654 = vpow2.f32 %v944_v50 }
 0x315   : > { %v2353_v22 = vpop.eup %1644  ;;  %v946_v1 = vmul.f32 1.442695, %v862_v38  ;;  %v948_v41 = vmul.f32 1.442695, %v863_v9  ;;  %1053 = vadd.xlane.f32.xlu1 %v1052_v21 }
 0x316   : > { %v2355_v53 = vpop.eup %1646  ;;  %v781_v17 = vpop.xlane.xlu1 %780 }
 0x317   : > { %1656 = vpow2.f32 %v946_v1  ;;  %v864_v3 = vsub.f32 %v2163_v27, %v781_v17  ;;  %v865_v12 = vsub.f32 %v2165_v28, %v781_v17  ;;  %v1055_v24 = vadd.f32 %v2355_v53, %v2353_v22 }
 0x318   : > { %1658 = vpow2.f32 %v948_v41 }
 0x319   : > { %v2361_v25 = vpop.eup %1648  ;;  %v950_v44 = vmul.f32 1.442695, %v864_v3  ;;  %v952_v55 = vmul.f32 1.442695, %v865_v12  ;;  %1056 = vadd.xlane.f32.xlu1 %v1055_v24 }
 0x31a   : > { %v2363_v16 = vpop.eup %1650  ;;  %v784_v58 = vpop.xlane.xlu1 %783 }
 0x31b   : > { %1660 = vpow2.f32 %v950_v44  ;;  %v866_v6 = vsub.f32 %v2169_v30, %v784_v58  ;;  %v867_v18 = vsub.f32 %v2171_v31, %v784_v58  ;;  %v1058_v27 = vadd.f32 %v2363_v16, %v2361_v25 }
 0x31c   : > { %1662 = vpow2.f32 %v952_v55 }
 0x31d   : > { %v2369_v28 = vpop.eup %1652  ;;  %v954_v47 = vmul.f32 1.442695, %v866_v6  ;;  %v956_v50 = vmul.f32 1.442695, %v867_v18  ;;  %1059 = vadd.xlane.f32.xlu1 %v1058_v27 }
 0x31e   : > { %v2371_v62 = vpop.eup %1654  ;;  %v787_v38 = vpop.xlane.xlu1 %786 }
 0x31f   : > { %1664 = vpow2.f32 %v954_v47  ;;  %v868_v9 = vsub.f32 %v2175_v33, %v787_v38  ;;  %v869_v21 = vsub.f32 %v2177_v34, %v787_v38  ;;  %v1061_v30 = vadd.f32 %v2371_v62, %v2369_v28 }
 0x320   : > { %1666 = vpow2.f32 %v956_v50 }
 0x321   : > { %v2377_v31 = vpop.eup %1656  ;;  %v958_v1 = vmul.f32 1.442695, %v868_v9  ;;  %v960_v41 = vmul.f32 1.442695, %v869_v21  ;;  %1062 = vadd.xlane.f32.xlu1 %v1061_v30 }
 0x322   : > { %v2379_v17 = vpop.eup %1658  ;;  %v790_v3 = vpop.xlane.xlu1 %789 }
 0x323   : > { %1668 = vpow2.f32 %v958_v1  ;;  %v870_v12 = vsub.f32 %v2181_v36, %v790_v3  ;;  %v871_v24 = vsub.f32 %v2183_v37, %v790_v3  ;;  %v1064_v33 = vadd.f32 %v2379_v17, %v2377_v31 }
 0x324   : > { %1670 = vpow2.f32 %v960_v41 }
 0x325   : > { %v2385_v34 = vpop.eup %1660  ;;  %v962_v44 = vmul.f32 1.442695, %v870_v12  ;;  %v964_v55 = vmul.f32 1.442695, %v871_v24  ;;  %1065 = vadd.xlane.f32.xlu1 %v1064_v33 }
 0x326   : > { %v2387_v58 = vpop.eup %1662  ;;  %v793_v6 = vpop.xlane.xlu1 %792 }
 0x327   : > { %1672 = vpow2.f32 %v962_v44  ;;  %v872_v18 = vsub.f32 %v2187_v39, %v793_v6  ;;  %v873_v27 = vsub.f32 %v2189_v40, %v793_v6  ;;  %v1067_v36 = vadd.f32 %v2387_v58, %v2385_v34 }
 0x328   : > { %1674 = vpow2.f32 %v964_v55 }
 0x329   : > { %v2393_v37 = vpop.eup %1664  ;;  %v966_v47 = vmul.f32 1.442695, %v872_v18  ;;  %v968_v50 = vmul.f32 1.442695, %v873_v27  ;;  %1068 = vadd.xlane.f32.xlu1 %v1067_v36 }
 0x32a   : > { %v2395_v38 = vpop.eup %1666  ;;  %v796_v9 = vpop.xlane.xlu1 %795 }
 0x32b   : > { %1676 = vpow2.f32 %v966_v47  ;;  %v874_v21 = vsub.f32 %v2193_v42, %v796_v9  ;;  %v875_v30 = vsub.f32 %v2195_v43, %v796_v9  ;;  %v1070_v39 = vadd.f32 %v2395_v38, %v2393_v37 }
 0x32c   : > { %1678 = vpow2.f32 %v968_v50 }
 0x32d   : > { %v2401_v40 = vpop.eup %1668  ;;  %v970_v1 = vmul.f32 1.442695, %v874_v21  ;;  %v972_v41 = vmul.f32 1.442695, %v875_v30  ;;  %1071 = vadd.xlane.f32.xlu0 %v1070_v39 }
 0x32e   : > { %v2403_v3 = vpop.eup %1670  ;;  %v799_v12 = vpop.xlane.xlu0 %798 }
 0x32f   : > { %1680 = vpow2.f32 %v970_v1  ;;  %v876_v24 = vsub.f32 %v2199_v45, %v799_v12  ;;  %v877_v33 = vsub.f32 %v2201_v46, %v799_v12  ;;  %v1073_v42 = vadd.f32 %v2403_v3, %v2401_v40 }
 0x330   : > { %1682 = vpow2.f32 %v972_v41 }
 0x331   : > { %v2409_v43 = vpop.eup %1672  ;;  %v974_v44 = vmul.f32 1.442695, %v876_v24  ;;  %v976_v55 = vmul.f32 1.442695, %v877_v33  ;;  %1074 = vadd.xlane.f32.xlu1 %v1073_v42 }
 0x332   : > { %v2411_v6 = vpop.eup %1674  ;;  %v802_v18 = vpop.xlane.xlu1 %801 }
 0x333   : > { %1684 = vpow2.f32 %v974_v44  ;;  %v878_v27 = vsub.f32 %v2205_v48, %v802_v18  ;;  %v879_v36 = vsub.f32 %v2207_v49, %v802_v18  ;;  %v1076_v45 = vadd.f32 %v2411_v6, %v2409_v43 }
 0x334   : > { %1686 = vpow2.f32 %v976_v55 }
 0x335   : > { %v2417_v46 = vpop.eup %1676  ;;  %v978_v47 = vmul.f32 1.442695, %v878_v27  ;;  %v980_v50 = vmul.f32 1.442695, %v879_v36  ;;  %1077 = vadd.xlane.f32.xlu0 %v1076_v45 }
 0x336   : > { %v2419_v9 = vpop.eup %1678  ;;  %v805_v21 = vpop.xlane.xlu1 %804 }
 0x337   : > { %1688 = vpow2.f32 %v978_v47  ;;  %v880_v30 = vsub.f32 %v2211_v51, %v805_v21  ;;  %v881_v39 = vsub.f32 %v2213_v52, %v805_v21  ;;  %v1079_v48 = vadd.f32 %v2419_v9, %v2417_v46 }
 0x338   : > { %1690 = vpow2.f32 %v980_v50 }
 0x339   : > { %v2425_v49 = vpop.eup %1680  ;;  %v982_v1 = vmul.f32 1.442695, %v880_v30  ;;  %v984_v41 = vmul.f32 1.442695, %v881_v39  ;;  %1080 = vadd.xlane.f32.xlu1 %v1079_v48 }
 0x33a   : > { %v2427_v12 = vpop.eup %1682  ;;  %v808_v24 = vpop.xlane.xlu1 %807 }
 0x33b   : > { %1692 = vpow2.f32 %v982_v1  ;;  %v882_v33 = vsub.f32 %v2217_v54, %v808_v24  ;;  %v883_v42 = vsub.f32 %v2219_v57, %v808_v24  ;;  %v1082_v51 = vadd.f32 %v2427_v12, %v2425_v49 }
 0x33c   : > { %1694 = vpow2.f32 %v984_v41 }
 0x33d   : > { %v2433_v52 = vpop.eup %1684  ;;  %v986_v44 = vmul.f32 1.442695, %v882_v33  ;;  %v988_v55 = vmul.f32 1.442695, %v883_v42  ;;  %1083 = vadd.xlane.f32.xlu0 %v1082_v51 }
 0x33e   : > { %v2435_v18 = vpop.eup %1686  ;;  %v811_v27 = vpop.xlane.xlu1 %810 }
 0x33f   : > { %1696 = vpow2.f32 %v986_v44  ;;  %v884_v36 = vsub.f32 %v2223_v63, %v811_v27  ;;  %v885_v45 = vsub.f32 %v2225_v2, %v811_v27  ;;  %v1085_v54 = vadd.f32 %v2435_v18, %v2433_v52 }
 0x340   : > { %1698 = vpow2.f32 %v988_v55 }
 0x341   : > { %v2441_v57 = vpop.eup %1688  ;;  %v990_v47 = vmul.f32 1.442695, %v884_v36  ;;  %v992_v50 = vmul.f32 1.442695, %v885_v45  ;;  %1086 = vadd.xlane.f32.xlu1 %v1085_v54 }
 0x342   : > { %v2443_v21 = vpop.eup %1690  ;;  %v814_v30 = vpop.xlane.xlu1 %813 }
 0x343   : > { %1700 = vpow2.f32 %v990_v47  ;;  %v886_v39 = vsub.f32 %v2229_v8, %v814_v30  ;;  %v887_v48 = vsub.f32 %v2231_v11, %v814_v30  ;;  %v1088_v63 = vadd.f32 %v2443_v21, %v2441_v57 }
 0x344   : > { %1702 = vpow2.f32 %v992_v50 }
 0x345   : > { %v2449_v2 = vpop.eup %1692  ;;  %v994_v1 = vmul.f32 1.442695, %v886_v39  ;;  %v996_v41 = vmul.f32 1.442695, %v887_v48  ;;  %1089 = vadd.xlane.f32.xlu0 %v1088_v63  ;;  %v2822_v48 = vld [vmem:[#allocation11_spill] sm:$0xff] }
 0x346   : > { %v2451_v24 = vpop.eup %1694  ;;  %v817_v33 = vpop.xlane.xlu1 %816 }
 0x347   : > { %1704 = vpow2.f32 %v994_v1  ;;  %v888_v42 = vsub.f32 %v2235_v20, %v817_v33  ;;  %v889_v51 = vsub.f32 %v2237_v23, %v817_v33  ;;  %v1091_v8 = vadd.f32 %v2451_v24, %v2449_v2  ;;  %v2823_v1 = vld [vmem:[#allocation12_spill] sm:$0xff] }
 0x348   : > { %1706 = vpow2.f32 %v996_v41 }
 0x349   : > { %v2457_v11 = vpop.eup %1696  ;;  %v998_v44 = vmul.f32 1.442695, %v888_v42  ;;  %v1000_v55 = vmul.f32 1.442695, %v889_v51  ;;  %1092 = vadd.xlane.f32.xlu1 %v1091_v8 }
 0x34a   : > { %v2459_v27 = vpop.eup %1698  ;;  %v820_v36 = vpop.xlane.xlu1 %819 }
 0x34b   : > { %1708 = vpow2.f32 %v998_v44  ;;  %v890_v45 = vsub.f32 %v2241_v29, %v820_v36  ;;  %v891_v54 = vsub.f32 %v2243_v32, %v820_v36  ;;  %v1094_v20 = vadd.f32 %v2459_v27, %v2457_v11  ;;  %v2825_v44 = vld [vmem:[#allocation13_spill] sm:$0xff]  ;;  %v2826_v36 = vld [vmem:[#allocation14_spill] sm:$0xff] }
 0x34c   : > { %1710 = vpow2.f32 %v1000_v55 }
 0x34d   : > { %v2465_v23 = vpop.eup %1700  ;;  %v1002_v47 = vmul.f32 1.442695, %v890_v45  ;;  %v1004_v50 = vmul.f32 1.442695, %v891_v54  ;;  %1095 = vadd.xlane.f32.xlu0 %v1094_v20 }
 0x34e   : > { %v2467_v30 = vpop.eup %1702  ;;  %v823_v39 = vpop.xlane.xlu1 %822 }
 0x34f   : > { %1712 = vpow2.f32 %v1002_v47  ;;  %v892_v63 = vsub.f32 %v2822_v48, %v823_v39  ;;  %v893_v41 = vsub.f32 %v2823_v1, %v823_v39  ;;  %v1097_v29 = vadd.f32 %v2467_v30, %v2465_v23 }
 0x350   : > { %1714 = vpow2.f32 %v1004_v50 }
 0x351   : > { %v2473_v32 = vpop.eup %1704  ;;  %v1006_v33 = vmul.f32 1.442695, %v892_v63  ;;  %v1008_v42 = vmul.f32 1.442695, %v893_v41  ;;  %1098 = vadd.xlane.f32.xlu1 %v1097_v29  ;;  %v2829_v63 = vld [vmem:[#allocation15_spill] sm:$0xff]  ;;  %v2830_v41 = vld [vmem:[#allocation16_spill] sm:$0xff] }
 0x352   : > { %2824 = vst [vmem:[#allocation11_spill] sm:$0xff] %v2473_v32  ;;  %v2475_v51 = vpop.eup %1706  ;;  %v826_v8 = vpop.xlane.xlu1 %825 }
 0x353   : > { %1716 = vpow2.f32 %v1006_v33  ;;  %v894_v55 = vsub.f32 %v2825_v44, %v826_v8  ;;  %v895_v45 = vsub.f32 %v2826_v36, %v826_v8  ;;  %v1100_v54 = vadd.f32 %v2475_v51, %v2473_v32 }
 0x354   : > { %1718 = vpow2.f32 %v1008_v42 }
 0x355   : > { %v2481_v20 = vpop.eup %1708  ;;  %v1010_v47 = vmul.f32 1.442695, %v894_v55  ;;  %v1012_v50 = vmul.f32 1.442695, %v895_v45  ;;  %1101 = vadd.xlane.f32.xlu0 %v1100_v54  ;;  %v2833_v45 = vld [vmem:[#allocation17_spill] sm:$0xff] }
 0x356   : > { %2827 = vst [vmem:[#allocation12_spill] sm:$0xff] %v2481_v20  ;;  %v2483_v39 = vpop.eup %1710  ;;  %v829_v48 = vpop.xlane.xlu1 %828 }
 0x357   : > { %2828 = vst [vmem:[#allocation13_spill] sm:$0xff] %v2483_v39  ;;  %1720 = vpow2.f32 %v1010_v47  ;;  %v896_v1 = vsub.f32 %v2829_v63, %v829_v48  ;;  %v897_v29 = vsub.f32 %v2830_v41, %v829_v48  ;;  %v1103_v33 = vadd.f32 %v2483_v39, %v2481_v20  ;;  %v2834_v47 = vld [vmem:[#allocation18_spill] sm:$0xff] }
 0x358   : > { %1722 = vpow2.f32 %v1012_v50 }
 0x359   : > { %v2489_v8 = vpop.eup %1712  ;;  %v1014_v42 = vmul.f32 1.442695, %v896_v1  ;;  %v1016_v44 = vmul.f32 1.442695, %v897_v29  ;;  %1104 = vadd.xlane.f32.xlu1 %v1103_v33  ;;  %v2836_v33 = vld [vmem:[#allocation19_spill] sm:$0xff] }
 0x35a   : > { %2831 = vst [vmem:[#allocation14_spill] sm:$0xff] %v2489_v8  ;;  %v2491_v55 = vpop.eup %1714  ;;  %v832_v36 = vpop.xlane.xlu1 %831 }
 0x35b   : > { %2832 = vst [vmem:[#allocation15_spill] sm:$0xff] %v2491_v55  ;;  %1724 = vpow2.f32 %v1014_v42  ;;  %v898_v54 = vsub.f32 %v2833_v45, %v832_v36  ;;  %v899_v32 = vsub.f32 %v2834_v47, %v832_v36  ;;  %v1106_v48 = vadd.f32 %v2491_v55, %v2489_v8  ;;  %v2837_v42 = vld [vmem:[#allocation20_spill] sm:$0xff] }
 0x35c   : > { %1726 = vpow2.f32 %v1016_v44 }
 0x35d   : > { %v2497_v63 = vpop.eup %1716  ;;  %v1018_v50 = vmul.f32 1.442695, %v898_v54  ;;  %v1020_v41 = vmul.f32 1.442695, %v899_v32  ;;  %1107 = vadd.xlane.f32.xlu0 %v1106_v48  ;;  %v2838_v48 = vld [vmem:[#allocation21_spill] sm:$0xff] }
 0x35e   : > { %2835 = vst [vmem:[#allocation16_spill] sm:$0xff] %v2497_v63  ;;  %v2499_v1 = vpop.eup %1718  ;;  %v835_v29 = vpop.xlane.xlu1 %834 }
 0x35f   : > { %1728 = vpow2.f32 %v1018_v50  ;;  %v900_v20 = vsub.f32 %v2836_v33, %v835_v29  ;;  %v901_v39 = vsub.f32 %v2837_v42, %v835_v29  ;;  %v1109_v36 = vadd.f32 %v2499_v1, %v2497_v63  ;;  %v2839_v50 = vld [vmem:[#allocation22_spill] sm:$0xff] }
 0x360   : > { %1730 = vpow2.f32 %v1020_v41 }
 0x361   : > { %v2505_v45 = vpop.eup %1720  ;;  %v1022_v44 = vmul.f32 1.442695, %v900_v20  ;;  %v1024_v47 = vmul.f32 1.442695, %v901_v39  ;;  %1110 = vadd.xlane.f32.xlu1 %v1109_v36 }
 0x362   : > { %v2507_v54 = vpop.eup %1722  ;;  %v838_v32 = vpop.xlane.xlu1 %837 }
 0x363   : > { %1732 = vpow2.f32 %v1022_v44  ;;  %v902_v8 = vsub.f32 %v2838_v48, %v838_v32  ;;  %v903_v55 = vsub.f32 %v2839_v50, %v838_v32  ;;  %v1112_v29 = vadd.f32 %v2507_v54, %v2505_v45  ;;  %v2840_v44 = vld [vmem:[#allocation23_spill] sm:$0xff] }
 0x364   : > { %1734 = vpow2.f32 %v1024_v47 }
 0x365   : > { %v2513_v33 = vpop.eup %1724  ;;  %v1026_v41 = vmul.f32 1.442695, %v902_v8  ;;  %v1028_v42 = vmul.f32 1.442695, %v903_v55  ;;  %1113 = vadd.xlane.f32.xlu0 %v1112_v29 }
 0x366   : > { %v2515_v20 = vpop.eup %1726  ;;  %v841_v39 = vpop.xlane.xlu1 %840 }
 0x367   : > { %1736 = vpow2.f32 %v1026_v41  ;;  %v904_v36 = vsub.f32 %v2283_v60, %v841_v39  ;;  %v905_v63 = vsub.f32 %v2840_v44, %v841_v39  ;;  %v1115_v32 = vadd.f32 %v2515_v20, %v2513_v33 }
 0x368   : > { %1738 = vpow2.f32 %v1028_v42 }
 0x369   : > { %v2521_v48 = vpop.eup %1728  ;;  %v1030_v47 = vmul.f32 1.442695, %v904_v36  ;;  %v1032_v50 = vmul.f32 1.442695, %v905_v63  ;;  %1116 = vadd.xlane.f32.xlu1 %v1115_v32 }
 0x36a   : > { %v2523_v8 = vpop.eup %1730 }
 0x36b   : > { %1740 = vpow2.f32 %v1030_v47  ;;  %v1118_v55 = vadd.f32 %v2523_v8, %v2521_v48 }
 0x36c   : > { %1742 = vpow2.f32 %v1032_v50 }
 0x36d   : > { %v2527_v29 = vpop.eup %1732  ;;  %1119 = vadd.xlane.f32.xlu0 %v1118_v55 }
 0x36e   : > { %v2529_v60 = vpop.eup %1734 }
 0x36f   : > { %v1121_v41 = vadd.f32 %v2529_v60, %v2527_v29 }
 0x371   : > { %v2533_v42 = vpop.eup %1736  ;;  %1122 = vadd.xlane.f32.xlu1 %v1121_v41 }
 0x372   : > { %2841 = vst [vmem:[#allocation17_spill] sm:$0xff] %v2533_v42  ;;  %v2535_v63 = vpop.eup %1738 }
 0x373   : > { %2842 = vst [vmem:[#allocation18_spill] sm:$0xff] %v2535_v63  ;;  %v1124_v39 = vadd.f32 %v2535_v63, %v2533_v42 }
 0x375   : > { %v2539_v36 = vpop.eup %1740  ;;  %1125 = vadd.xlane.f32.xlu0 %v1124_v39 }
 0x376   : > { %2843 = vst [vmem:[#allocation19_spill] sm:$0xff] %v2539_v36  ;;  %v2541_v44 = vpop.eup %1742 }
 0x377   : > { %2844 = vst [vmem:[#allocation20_spill] sm:$0xff] %v2541_v44  ;;  %v1127_v32 = vadd.f32 %v2541_v44, %v2539_v36 }
 0x379   : > { %1128 = vadd.xlane.f32.xlu1 %v1127_v32 }
 0x38a   : > { %v1036_v47 = vpop.xlane.xlu1 %1035 }
 0x38b   : > { %1744 = vrcp.f32 %v1036_v47 }
 0x38e   : > { %v1039_v50 = vpop.xlane.xlu1 %1038 }
 0x38f   : > { %1746 = vrcp.f32 %v1039_v50 }
 0x392   : > { %v1042_v55 = vpop.xlane.xlu1 %1041 }
 0x393   : > { %1748 = vrcp.f32 %v1042_v55 }
 0x395   : > { %v1745_v41 = vpop.eup %1744 }
 0x396   : > { %v1045_v42 = vpop.xlane.xlu1 %1044  ;;  %v1163_v39 = vmul.f32 %v1745_v41, %v2299_v5  ;;  %v1162_v63 = vmul.f32 %v1745_v41, %v2297_v59 }
 0x397   : > { %1750 = vrcp.f32 %v1045_v42 }
 0x398   : > { %1317 = vst [vmem:[%s2551_s21 + $0x8] sm:$0xff] %v1163_v39  ;;  %1316 = vst [vmem:[%s2551_s21] sm:$0xff] %v1162_v63 }
 0x399   : > { %v1747_v32 = vpop.eup %1746 }
 0x39a   : > { %v1048_v47 = vpop.xlane.xlu1 %1047  ;;  %v1165_v50 = vmul.f32 %v1747_v32, %v2307_v26  ;;  %v1164_v55 = vmul.f32 %v1747_v32, %v2305_v0 }
 0x39b   : > { %1752 = vrcp.f32 %v1048_v47 }
 0x39c   : > { %v1229_v5 = vpack.c.bf16 %v1165_v50, %v1163_v39  ;;  %1319 = vst [vmem:[%s2551_s21 + $0x18] sm:$0xff] %v1165_v50  ;;  %v1228_v59 = vpack.c.bf16 %v1164_v55, %v1162_v63  ;;  %1318 = vst [vmem:[%s2551_s21 + $0x10] sm:$0xff] %v1164_v55 }
 0x39d   : > { %v1749_v42 = vpop.eup %1748 }
 0x39e   : > { %1260 = vmatprep.subr.bf16.mxu1 %v1229_v5  ;;  %v1051_v41 = vpop.xlane.xlu1 %1050  ;;  %v1167_v36 = vmul.f32 %v1749_v42, %v2315_v56  ;;  %v1166_v44 = vmul.f32 %v1749_v42, %v2313_v4 }
 0x39f   : > { %1754 = vrcp.f32 %v1051_v41  ;;  %1261 = vmatpush1.bf16.xpose.msra.mxu1 %v1228_v59 }
 0x3a0   : > { %1321 = vst [vmem:[%s2551_s21 + $0x28] sm:$0xff] %v1167_v36  ;;  %1320 = vst [vmem:[%s2551_s21 + $0x20] sm:$0xff] %v1166_v44 }
 0x3a1   : > { %v1751_v26 = vpop.eup %1750 }
 0x3a2   : > { %v1054_v0 = vpop.xlane.xlu1 %1053  ;;  %v1169_v63 = vmul.f32 %v1751_v26, %v2323_v15  ;;  %v1168_v39 = vmul.f32 %v1751_v26, %v2321_v7 }
 0x3a3   : > { %1756 = vrcp.f32 %v1054_v0 }
 0x3a4   : > { %v1231_v32 = vpack.c.bf16 %v1169_v63, %v1167_v36  ;;  %1323 = vst [vmem:[%s2551_s21 + $0x38] sm:$0xff] %v1169_v63  ;;  %v1230_v47 = vpack.c.bf16 %v1168_v39, %v1166_v44  ;;  %1322 = vst [vmem:[%s2551_s21 + $0x30] sm:$0xff] %v1168_v39 }
 0x3a5   : > { %v1753_v56 = vpop.eup %1752 }
 0x3a6   : > { %1262 = vmatprep.subr.bf16.mxu1 %v1231_v32  ;;  %v1057_v4 = vpop.xlane.xlu1 %1056  ;;  %v1171_v50 = vmul.f32 %v1753_v56, %v2331_v35  ;;  %v1170_v55 = vmul.f32 %v1753_v56, %v2329_v10 }
 0x3a7   : > { %1758 = vrcp.f32 %v1057_v4  ;;  %1263 = vmatpush1.bf16.xpose.msra.mxu1 %v1230_v47 }
 0x3a8   : > { %1325 = vst [vmem:[%s2551_s21 + $0x48] sm:$0xff] %v1171_v50  ;;  %1324 = vst [vmem:[%s2551_s21 + $0x40] sm:$0xff] %v1170_v55 }
 0x3a9   : > { %v1755_v15 = vpop.eup %1754 }
 0x3aa   : > { %v1060_v7 = vpop.xlane.xlu1 %1059  ;;  %v1173_v36 = vmul.f32 %v1755_v15, %v2339_v13  ;;  %v1172_v44 = vmul.f32 %v1755_v15, %v2337_v14 }
 0x3ab   : > { %1760 = vrcp.f32 %v1060_v7 }
 0x3ac   : > { %v1233_v5 = vpack.c.bf16 %v1173_v36, %v1171_v50  ;;  %1327 = vst [vmem:[%s2551_s21 + $0x58] sm:$0xff] %v1173_v36  ;;  %v1232_v59 = vpack.c.bf16 %v1172_v44, %v1170_v55  ;;  %1326 = vst [vmem:[%s2551_s21 + $0x50] sm:$0xff] %v1172_v44 }
 0x3ad   : > { %v1757_v35 = vpop.eup %1756 }
 0x3ae   : > { %1264 = vmatprep.subr.bf16.mxu1 %v1233_v5  ;;  %v1063_v10 = vpop.xlane.xlu1 %1062  ;;  %v1175_v42 = vmul.f32 %v1757_v35, %v2347_v61  ;;  %v1174_v41 = vmul.f32 %v1757_v35, %v2345_v19 }
 0x3af   : > { %1762 = vrcp.f32 %v1063_v10  ;;  %1265 = vmatpush1.bf16.xpose.msra.mxu1 %v1232_v59 }
 0x3b0   : > { %1329 = vst [vmem:[%s2551_s21 + $0x68] sm:$0xff] %v1175_v42  ;;  %1328 = vst [vmem:[%s2551_s21 + $0x60] sm:$0xff] %v1174_v41 }
 0x3b1   : > { %v1759_v13 = vpop.eup %1758 }
 0x3b2   : > { %v1066_v14 = vpop.xlane.xlu1 %1065  ;;  %v1177_v26 = vmul.f32 %v1759_v13, %v2355_v53  ;;  %v1176_v0 = vmul.f32 %v1759_v13, %v2353_v22 }
 0x3b3   : > { %1764 = vrcp.f32 %v1066_v14 }
 0x3b4   : > { %v1235_v63 = vpack.c.bf16 %v1177_v26, %v1175_v42  ;;  %1331 = vst [vmem:[%s2551_s21 + $0x78] sm:$0xff] %v1177_v26  ;;  %v1234_v39 = vpack.c.bf16 %v1176_v0, %v1174_v41  ;;  %1330 = vst [vmem:[%s2551_s21 + $0x70] sm:$0xff] %v1176_v0 }
 0x3b5   : > { %v1761_v61 = vpop.eup %1760 }
 0x3b6   : > { %1266 = vmatprep.subr.bf16.mxu1 %v1235_v63  ;;  %v1069_v19 = vpop.xlane.xlu1 %1068  ;;  %v1179_v32 = vmul.f32 %v1761_v61, %v2363_v16  ;;  %v1178_v47 = vmul.f32 %v1761_v61, %v2361_v25 }
 0x3b7   : > { %1766 = vrcp.f32 %v1069_v19  ;;  %1267 = vmatpush1.bf16.xpose.msra.mxu1 %v1234_v39 }
 0x3b8   : > { %1333 = vst [vmem:[%s2551_s21 + $0x88] sm:$0xff] %v1179_v32  ;;  %1332 = vst [vmem:[%s2551_s21 + $0x80] sm:$0xff] %v1178_v47 }
 0x3b9   : > { %v1763_v53 = vpop.eup %1762 }
 0x3ba   : > { %v1072_v22 = vpop.xlane.xlu0 %1071  ;;  %v1181_v56 = vmul.f32 %v1763_v53, %v2371_v62  ;;  %v1180_v4 = vmul.f32 %v1763_v53, %v2369_v28 }
 0x3bb   : > { %1768 = vrcp.f32 %v1072_v22 }
 0x3bc   : > { %v1237_v50 = vpack.c.bf16 %v1181_v56, %v1179_v32  ;;  %1335 = vst [vmem:[%s2551_s21 + $0x98] sm:$0xff] %v1181_v56  ;;  %v1236_v55 = vpack.c.bf16 %v1180_v4, %v1178_v47  ;;  %1334 = vst [vmem:[%s2551_s21 + $0x90] sm:$0xff] %v1180_v4 }
 0x3bd   : > { %v1765_v16 = vpop.eup %1764 }
 0x3be   : > { %1268 = vmatprep.subr.bf16.mxu1 %v1237_v50  ;;  %v1075_v25 = vpop.xlane.xlu1 %1074  ;;  %v1183_v15 = vmul.f32 %v1765_v16, %v2379_v17  ;;  %v1182_v7 = vmul.f32 %v1765_v16, %v2377_v31 }
 0x3bf   : > { %1770 = vrcp.f32 %v1075_v25  ;;  %1269 = vmatpush1.bf16.xpose.msra.mxu1 %v1236_v55 }
 0x3c0   : > { %1337 = vst [vmem:[%s2551_s21 + $0xa8] sm:$0xff] %v1183_v15  ;;  %1336 = vst [vmem:[%s2551_s21 + $0xa0] sm:$0xff] %v1182_v7 }
 0x3c1   : > { %v1767_v62 = vpop.eup %1766 }
 0x3c2   : > { %v1078_v28 = vpop.xlane.xlu0 %1077  ;;  %v1185_v36 = vmul.f32 %v1767_v62, %v2387_v58  ;;  %v1184_v44 = vmul.f32 %v1767_v62, %v2385_v34 }
 0x3c3   : > { %1772 = vrcp.f32 %v1078_v28 }
 0x3c4   : > { %v1239_v5 = vpack.c.bf16 %v1185_v36, %v1183_v15  ;;  %1339 = vst [vmem:[%s2551_s21 + $0xb8] sm:$0xff] %v1185_v36  ;;  %v1238_v59 = vpack.c.bf16 %v1184_v44, %v1182_v7  ;;  %1338 = vst [vmem:[%s2551_s21 + $0xb0] sm:$0xff] %v1184_v44 }
 0x3c5   : > { %v1769_v17 = vpop.eup %1768 }
 0x3c6   : > { %1270 = vmatprep.subr.bf16.mxu1 %v1239_v5  ;;  %v1081_v31 = vpop.xlane.xlu1 %1080  ;;  %v1187_v35 = vmul.f32 %v1769_v17, %v2395_v38  ;;  %v1186_v10 = vmul.f32 %v1769_v17, %v2393_v37 }
 0x3c7   : > { %1774 = vrcp.f32 %v1081_v31  ;;  %1271 = vmatpush1.bf16.xpose.msra.mxu1 %v1238_v59  ;;  %v2845_v31 = vld [vmem:[#allocation11_spill] sm:$0xff] }
 0x3c8   : > { %1341 = vst [vmem:[%s2551_s21 + $0xc8] sm:$0xff] %v1187_v35  ;;  %1340 = vst [vmem:[%s2551_s21 + $0xc0] sm:$0xff] %v1186_v10 }
 0x3c9   : > { %v1771_v58 = vpop.eup %1770 }
 0x3ca   : > { %v1084_v34 = vpop.xlane.xlu0 %1083  ;;  %v1189_v42 = vmul.f32 %v1771_v58, %v2403_v3  ;;  %v1188_v41 = vmul.f32 %v1771_v58, %v2401_v40 }
 0x3cb   : > { %1776 = vrcp.f32 %v1084_v34  ;;  %v2847_v34 = vld [vmem:[#allocation12_spill] sm:$0xff] }
 0x3cc   : > { %v1241_v13 = vpack.c.bf16 %v1189_v42, %v1187_v35  ;;  %1343 = vst [vmem:[%s2551_s21 + $0xd8] sm:$0xff] %v1189_v42  ;;  %v1240_v14 = vpack.c.bf16 %v1188_v41, %v1186_v10  ;;  %1342 = vst [vmem:[%s2551_s21 + $0xd0] sm:$0xff] %v1188_v41  ;;  %v2846_v10 = vld [vmem:[#allocation13_spill] sm:$0xff] }
 0x3cd   : > { %v1773_v38 = vpop.eup %1772 }
 0x3ce   : > { %1272 = vmatprep.subr.bf16.mxu1 %v1241_v13  ;;  %v1087_v37 = vpop.xlane.xlu1 %1086  ;;  %v1191_v26 = vmul.f32 %v1773_v38, %v2411_v6  ;;  %v1190_v0 = vmul.f32 %v1773_v38, %v2409_v43  ;;  %v2848_v38 = vld [vmem:[#allocation15_spill] sm:$0xff] }
 0x3cf   : > { %1778 = vrcp.f32 %v1087_v37  ;;  %1273 = vmatpush1.bf16.xpose.msra.mxu1 %v1240_v14 }
 0x3d0   : > { %1345 = vst [vmem:[%s2551_s21 + $0xe8] sm:$0xff] %v1191_v26  ;;  %1344 = vst [vmem:[%s2551_s21 + $0xe0] sm:$0xff] %v1190_v0 }
 0x3d1   : > { %v1775_v3 = vpop.eup %1774 }
 0x3d2   : > { %v1090_v40 = vpop.xlane.xlu0 %1089  ;;  %v1193_v63 = vmul.f32 %v1775_v3, %v2419_v9  ;;  %v1192_v39 = vmul.f32 %v1775_v3, %v2417_v46 }
 0x3d3   : > { %1780 = vrcp.f32 %v1090_v40 }
 0x3d4   : > { %v1243_v61 = vpack.c.bf16 %v1193_v63, %v1191_v26  ;;  %1347 = vst [vmem:[%s2551_s21 + $0xf8] sm:$0xff] %v1193_v63  ;;  %v1242_v19 = vpack.c.bf16 %v1192_v39, %v1190_v0  ;;  %1346 = vst [vmem:[%s2551_s21 + $0xf0] sm:$0xff] %v1192_v39  ;;  %v2849_v26 = vld [vmem:[#allocation14_spill] sm:$0xff]  ;;  %v2850_v39 = vld [vmem:[#allocation16_spill] sm:$0xff] }
 0x3d5   : > { %v1777_v6 = vpop.eup %1776 }
 0x3d6   : > { %1274 = vmatprep.subr.bf16.mxu1 %v1243_v61  ;;  %v1093_v43 = vpop.xlane.xlu1 %1092  ;;  %v1195_v32 = vmul.f32 %v1777_v6, %v2427_v12  ;;  %v1194_v47 = vmul.f32 %v1777_v6, %v2425_v49 }
 0x3d7   : > { %1782 = vrcp.f32 %v1093_v43  ;;  %1275 = vmatpush1.bf16.xpose.msra.mxu1 %v1242_v19 }
 0x3d8   : > { %1349 = vst [vmem:[%s2551_s21 + $0x108] sm:$0xff] %v1195_v32  ;;  %1348 = vst [vmem:[%s2551_s21 + $0x100] sm:$0xff] %v1194_v47 }
 0x3d9   : > { %v1779_v9 = vpop.eup %1778 }
 0x3da   : > { %v1096_v46 = vpop.xlane.xlu0 %1095  ;;  %v1197_v53 = vmul.f32 %v1779_v9, %v2435_v18  ;;  %v1196_v22 = vmul.f32 %v1779_v9, %v2433_v52 }
 0x3db   : > { %1784 = vrcp.f32 %v1096_v46 }
 0x3dc   : > { %v1245_v56 = vpack.c.bf16 %v1197_v53, %v1195_v32  ;;  %1351 = vst [vmem:[%s2551_s21 + $0x118] sm:$0xff] %v1197_v53  ;;  %v1244_v4 = vpack.c.bf16 %v1196_v22, %v1194_v47  ;;  %1350 = vst [vmem:[%s2551_s21 + $0x110] sm:$0xff] %v1196_v22 }
 0x3dd   : > { %v1781_v12 = vpop.eup %1780 }
 0x3de   : > { %1276 = vmatprep.subr.bf16.mxu1 %v1245_v56  ;;  %v1099_v49 = vpop.xlane.xlu1 %1098  ;;  %v1199_v50 = vmul.f32 %v1781_v12, %v2443_v21  ;;  %v1198_v55 = vmul.f32 %v1781_v12, %v2441_v57 }
 0x3df   : > { %1786 = vrcp.f32 %v1099_v49  ;;  %1277 = vmatpush1.bf16.xpose.msra.mxu1 %v1244_v4 }
 0x3e0   : > { %1353 = vst [vmem:[%s2551_s21 + $0x128] sm:$0xff] %v1199_v50  ;;  %1352 = vst [vmem:[%s2551_s21 + $0x120] sm:$0xff] %v1198_v55 }
 0x3e1   : > { %v1783_v18 = vpop.eup %1782 }
 0x3e2   : > { %v1102_v52 = vpop.xlane.xlu0 %1101  ;;  %v1201_v16 = vmul.f32 %v1783_v18, %v2451_v24  ;;  %v1200_v25 = vmul.f32 %v1783_v18, %v2449_v2 }
 0x3e3   : > { %1788 = vrcp.f32 %v1102_v52 }
 0x3e4   : > { %v1247_v15 = vpack.c.bf16 %v1201_v16, %v1199_v50  ;;  %1355 = vst [vmem:[%s2551_s21 + $0x138] sm:$0xff] %v1201_v16  ;;  %v1246_v7 = vpack.c.bf16 %v1200_v25, %v1198_v55  ;;  %1354 = vst [vmem:[%s2551_s21 + $0x130] sm:$0xff] %v1200_v25  ;;  %v2852_v16 = vld [vmem:[#allocation17_spill] sm:$0xff] }
 0x3e5   : > { %v1785_v21 = vpop.eup %1784 }
 0x3e6   : > { %1278 = vmatprep.subr.bf16.mxu1 %v1247_v15  ;;  %v1105_v57 = vpop.xlane.xlu1 %1104  ;;  %v1203_v62 = vmul.f32 %v1785_v21, %v2459_v27  ;;  %v1202_v28 = vmul.f32 %v1785_v21, %v2457_v11 }
 0x3e7   : > { %1790 = vrcp.f32 %v1105_v57  ;;  %1279 = vmatpush1.bf16.xpose.msra.mxu1 %v1246_v7  ;;  %v2854_v7 = vld [vmem:[#allocation19_spill] sm:$0xff] }
 0x3e8   : > { %1357 = vst [vmem:[%s2551_s21 + $0x148] sm:$0xff] %v1203_v62  ;;  %1356 = vst [vmem:[%s2551_s21 + $0x140] sm:$0xff] %v1202_v28 }
 0x3e9   : > { %v1787_v24 = vpop.eup %1786 }
 0x3ea   : > { %v1108_v2 = vpop.xlane.xlu0 %1107  ;;  %v1205_v36 = vmul.f32 %v1787_v24, %v2467_v30  ;;  %v1204_v44 = vmul.f32 %v1787_v24, %v2465_v23  ;;  %v2856_v24 = vld [vmem:[#allocation9_spill] sm:$0xff] }
 0x3eb   : > { %1792 = vrcp.f32 %v1108_v2 }
 0x3ec   : > { %v1249_v5 = vpack.c.bf16 %v1205_v36, %v1203_v62  ;;  %1359 = vst [vmem:[%s2551_s21 + $0x158] sm:$0xff] %v1205_v36  ;;  %v1248_v59 = vpack.c.bf16 %v1204_v44, %v1202_v28  ;;  %1358 = vst [vmem:[%s2551_s21 + $0x150] sm:$0xff] %v1204_v44  ;;  %v2855_v28 = vld [vmem:[#allocation10_spill] sm:$0xff] }
 0x3ed   : > { %v1789_v27 = vpop.eup %1788  ;;  %v2857_v2 = vpack.c.bf16 %v2855_v28, %v2856_v24 }
 0x3ee   : > { %1280 = vmatprep.subr.bf16.mxu1 %v1249_v5  ;;  %v1111_v11 = vpop.xlane.xlu1 %1110  ;;  %v1207_v17 = vmul.f32 %v1789_v27, %v2475_v51  ;;  %v1206_v35 = vmul.f32 %v1789_v27, %v2845_v31 }
 0x3ef   : > { %1794 = vrcp.f32 %v1111_v11  ;;  %1281 = vmatpush1.bf16.xpose.msra.mxu1 %v1248_v59 }
 0x3f0   : > { %1361 = vst [vmem:[%s2551_s21 + $0x168] sm:$0xff] %v1207_v17  ;;  %1360 = vst [vmem:[%s2551_s21 + $0x160] sm:$0xff] %v1206_v35 }
 0x3f1   : > { %v1791_v30 = vpop.eup %1790 }
 0x3f2   : > { %v1114_v23 = vpop.xlane.xlu0 %1113  ;;  %v1209_v58 = vmul.f32 %v1791_v30, %v2846_v10  ;;  %v1208_v42 = vmul.f32 %v1791_v30, %v2847_v34 }
 0x3f3   : > { %1796 = vrcp.f32 %v1114_v23 }
 0x3f4   : > { %v1251_v41 = vpack.c.bf16 %v1209_v58, %v1207_v17  ;;  %1363 = vst [vmem:[%s2551_s21 + $0x178] sm:$0xff] %v1209_v58  ;;  %v1250_v13 = vpack.c.bf16 %v1208_v42, %v1206_v35  ;;  %1362 = vst [vmem:[%s2551_s21 + $0x170] sm:$0xff] %v1208_v42 }
 0x3f5   : > { %v1793_v51 = vpop.eup %1792 }
 0x3f6   : > { %1282 = vmatprep.subr.bf16.mxu1 %v1251_v41  ;;  %v1117_v14 = vpop.xlane.xlu1 %1116  ;;  %v1211_v37 = vmul.f32 %v1793_v51, %v2848_v38  ;;  %v1210_v0 = vmul.f32 %v1793_v51, %v2849_v26 }
 0x3f7   : > { %1798 = vrcp.f32 %v1117_v14  ;;  %1283 = vmatpush1.bf16.xpose.msra.mxu1 %v1250_v13 }
 0x3f8   : > { %1365 = vst [vmem:[%s2551_s21 + $0x188] sm:$0xff] %v1211_v37  ;;  %1364 = vst [vmem:[%s2551_s21 + $0x180] sm:$0xff] %v1210_v0 }
 0x3f9   : > { %v1795_v3 = vpop.eup %1794 }
 0x3fa   : > { %v1120_v40 = vpop.xlane.xlu0 %1119  ;;  %v1213_v63 = vmul.f32 %v1795_v3, %v2499_v1  ;;  %v1212_v61 = vmul.f32 %v1795_v3, %v2850_v39 }
 0x3fb   : > { %1800 = vrcp.f32 %v1120_v40 }
 0x3fc   : > { %v1253_v19 = vpack.c.bf16 %v1213_v63, %v1211_v37  ;;  %1367 = vst [vmem:[%s2551_s21 + $0x198] sm:$0xff] %v1213_v63  ;;  %v1252_v6 = vpack.c.bf16 %v1212_v61, %v1210_v0  ;;  %1366 = vst [vmem:[%s2551_s21 + $0x190] sm:$0xff] %v1212_v61 }
 0x3fd   : > { %v1797_v43 = vpop.eup %1796 }
 0x3fe   : > { %1284 = vmatprep.subr.bf16.mxu1 %v1253_v19  ;;  %v1123_v32 = vpop.xlane.xlu1 %1122  ;;  %v1215_v47 = vmul.f32 %v1797_v43, %v2507_v54  ;;  %v1214_v9 = vmul.f32 %v1797_v43, %v2505_v45 }
 0x3ff   : > { %1802 = vrcp.f32 %v1123_v32  ;;  %1285 = vmatpush1.bf16.xpose.msra.mxu1 %v1252_v6 }
 0x400   : > { %1369 = vst [vmem:[%s2551_s21 + $0x1a8] sm:$0xff] %v1215_v47  ;;  %1368 = vst [vmem:[%s2551_s21 + $0x1a0] sm:$0xff] %v1214_v9 }
 0x401   : > { %v1799_v1 = vpop.eup %1798 }
 0x402   : > { %v1126_v46 = vpop.xlane.xlu0 %1125  ;;  %v1217_v53 = vmul.f32 %v1799_v1, %v2515_v20  ;;  %v1216_v22 = vmul.f32 %v1799_v1, %v2513_v33 }
 0x403   : > { %1804 = vrcp.f32 %v1126_v46 }
 0x404   : > { %v1255_v56 = vpack.c.bf16 %v1217_v53, %v1215_v47  ;;  %1371 = vst [vmem:[%s2551_s21 + $0x1b8] sm:$0xff] %v1217_v53  ;;  %v1254_v4 = vpack.c.bf16 %v1216_v22, %v1214_v9  ;;  %1370 = vst [vmem:[%s2551_s21 + $0x1b0] sm:$0xff] %v1216_v22 }
 0x405   : > { %v1801_v45 = vpop.eup %1800 }
 0x406   : > { %1286 = vmatprep.subr.bf16.mxu1 %v1255_v56  ;;  %v1129_v54 = vpop.xlane.xlu1 %1128  ;;  %v1219_v12 = vmul.f32 %v1801_v45, %v2523_v8  ;;  %v1218_v49 = vmul.f32 %v1801_v45, %v2521_v48  ;;  %v2851_v48 = vld [vmem:[#allocation18_spill] sm:$0xff] }
 0x407   : > { %1806 = vrcp.f32 %v1129_v54  ;;  %1287 = vmatpush1.bf16.xpose.msra.mxu1 %v1254_v4 }
 0x408   : > { %1373 = vst [vmem:[%s2551_s21 + $0x1c8] sm:$0xff] %v1219_v12  ;;  %1372 = vst [vmem:[%s2551_s21 + $0x1c0] sm:$0xff] %v1218_v49 }
 0x409   : > { %v1803_v33 = vpop.eup %1802 }
 0x40a   : > { %v1221_v20 = vmul.f32 %v1803_v33, %v2529_v60  ;;  %v1220_v50 = vmul.f32 %v1803_v33, %v2527_v29  ;;  %v2853_v29 = vld [vmem:[#allocation20_spill] sm:$0xff] }
 0x40c   : > { %v1257_v55 = vpack.c.bf16 %v1221_v20, %v1219_v12  ;;  %1375 = vst [vmem:[%s2551_s21 + $0x1d8] sm:$0xff] %v1221_v20  ;;  %v1256_v18 = vpack.c.bf16 %v1220_v50, %v1218_v49  ;;  %1374 = vst [vmem:[%s2551_s21 + $0x1d0] sm:$0xff] %v1220_v50 }
 0x40d   : > { %v1805_v8 = vpop.eup %1804 }
 0x40e   : > { %1288 = vmatprep.subr.bf16.mxu1 %v1257_v55  ;;  %v1223_v52 = vmul.f32 %v1805_v8, %v2851_v48  ;;  %v1222_v25 = vmul.f32 %v1805_v8, %v2852_v16 }
 0x40f   : > { %1289 = vmatpush1.bf16.xpose.msra.mxu1 %v1256_v18 }
 0x410   : > { %1377 = vst [vmem:[%s2551_s21 + $0x1e8] sm:$0xff] %v1223_v52  ;;  %1376 = vst [vmem:[%s2551_s21 + $0x1e0] sm:$0xff] %v1222_v25 }
 0x411   : > { %v1807_v60 = vpop.eup %1806 }
 0x412   : > { %v1225_v15 = vmul.f32 %v1807_v60, %v2853_v29  ;;  %v1224_v21 = vmul.f32 %v1807_v60, %v2854_v7 }
 0x414   : > { %v1259_v57 = vpack.c.bf16 %v1225_v15, %v1223_v52  ;;  %1379 = vst [vmem:[%s2551_s21 + $0x1f8] sm:$0xff] %v1225_v15  ;;  %v1258_v62 = vpack.c.bf16 %v1224_v21, %v1222_v25  ;;  %1378 = vst [vmem:[%s2551_s21 + $0x1f0] sm:$0xff] %v1224_v21 }
 0x416   : > { %1290 = vmatprep.subr.bf16.mxu1 %v1259_v57 }
 0x417   : > { %1291 = vmatpush1.bf16.xpose.msra.mxu1 %v1258_v62 }
 0x41e   : > { %1293 = vmatmul.mubr.bf16.vlgmr.msra.gmra.mrb[64].mxu1 %v2857_v2 }
 0x41f   : > { %1825 = shalt.err (!%p1822_p3)
}
 0x420   : > { %s1826_s11 = scalar_lea.hbm %s2686_s29, 8192  ;;  %s1830_s14 = scalar_lea.hbm %s2779_s4, 16384 }
 0x421   : > { %p1827_p4 = scmp.ne.s32.totalorder %s2686_s29, %s1826_s11  ;;  %p1831_p9 = scmp.lt.u32.totalorder %s2686_s29, %s2779_s4 }
 0x422   : > { %p1832_p10 = scmp.lt.u32.totalorder %s1830_s14, %s1826_s11  ;;  %p1834_p12 = scmp.lt.u32.totalorder %s1826_s11, %s2686_s29 }
 0x423   : > { %p1828_p7 = pnand %p1827_p4, %p1979_p5 }
 0x424   : > { %p1833_p11 = por %p1832_p10, %p1831_p9 }
 0x425   : > { %p1829_p8 = pneg %p1828_p7 }
 0x426   : > { %p1835_p13 = por %p1834_p12, %p1833_p11 }
 0x428   : > { %p1836_p0 = pnand %p1835_p13, %p1829_p8 }
 0x42a   : > { %1839 = shalt.err (!%p1836_p0)
}
 0x42b   : > { %s1910_s23 = smov 256   ;;  %s1911_s24 = smov 16   ;;  %v1808_v17 = vld [vmem:[%s1996_s6] sm:$0xff]  ;;  %v1809_v23 = vld [vmem:[%s1996_s6 + $0x8] sm:$0xff]  ;;  %v1810_v34 = vld [vmem:[%s1996_s6 + $0x10] sm:$0xff] }
 0x42c   : > { %1570 = dma.vmem_to_hbm [thread:$0]  (%p1979_p5), %s2689_s30, 8192, %s2686_s29, %s1386_s5, %s1910_s23, %s1910_s23, %s1911_s24  }
 0x42d   : > { %s208_s28 = sld [smem:[#allocation2]]  ;;  %s1513_s7 = sshll.u32 %s2546_s15, 5  ;;  %v1811_v41 = vld [vmem:[%s1996_s6 + $0x18] sm:$0xff] }
 0x42e   : > { %s195_s8 = scalar_lea.vmem [#allocation3], %s1513_s7  ;;  %s1562_s10 = sshll.u32 %s1962_s2, 9 }
 0x42f   : > { %s1399_s9 = sshll.u32 %s195_s8, 4  ;;  %s2729_s5 = scalar_lea.hbm %s2778_s3, %s1562_s10  ;;  %s2723_s9 = int_to_ptr.vmem [resolvable:$true] %s1399_s9 }
 0x430   : > { %s1381_s2 = scalar_lea.sflag [#allocation4], %s2546_s15  ;;  %s1840_s11 = scalar_lea.vmem %s2723_s9, 512 }
 0x431   : > { %p1841_p1 = scmp.ne.s32.totalorder %s2723_s9, %s1840_s11  ;;  %s1912_s12 = smov [#allocation3]  }
 0x432   : > { %s1844_s13 = sshll.u32 %s1912_s12, 4  ;;  %s1845_s13 = int_to_ptr.vmem [resolvable:$false] %s1844_s13 }
 0x433   : > { %v1303_v36 = vstv %s208_s28  ;;  %p1842_p2 = pnand %p1841_p1, %p1979_p5  ;;  %s1846_s14 = scalar_lea.vmem %s1845_s13, 1024 }
 0x434   : > { %p1847_p4 = scmp.lt.s32.totalorder %s2723_s9, %s1845_s13  ;;  %p1848_p7 = scmp.lt.s32.totalorder %s1846_s14, %s1840_s11 }
 0x435   : > { %p1843_p3 = pneg %p1842_p2 }
 0x436   : > { %p1849_p8 = por %p1848_p7, %p1847_p4 }
 0x438   : > { %p1850_p9 = pnand %p1849_p8, %p1843_p3 }
 0x4f1   : > { %v1294_v44 = vpop.f32.mrb[64].mxu1 }
 0x4f2   : > { %v1304_v5 = vmul.f32 %v1303_v36, %v1294_v44  ;;  %v1296_v59 = vpop.f32.mrb[65].mxu1 }
 0x4f3   : > { %v1305_v27 = vmul.f32 %v1303_v36, %v1296_v59  ;;  %v1298_v11 = vpop.f32.mrb[66].mxu1 }
 0x4f4   : > { %v1308_v31 = vadd.f32 %v1808_v17, %v1304_v5  ;;  %v1306_v35 = vmul.f32 %v1303_v36, %v1298_v11  ;;  %v1300_v30 = vpop.f32.mrb[67].mxu1 }
 0x4f5   : > { %v1309_v10 = vadd.f32 %v1809_v23, %v1305_v27  ;;  %v1307_v58 = vmul.f32 %v1303_v36, %v1300_v30 }
 0x4f6   : > { %1312 = vst [vmem:[%s195_s8] sm:$0xff] %v1308_v31  ;;  %v1310_v42 = vadd.f32 %v1810_v34, %v1306_v35 }
 0x4f7   : > { %1313 = vst [vmem:[%s195_s8 + $0x8] sm:$0xff] %v1309_v10  ;;  %v1311_v13 = vadd.f32 %v1811_v41, %v1307_v58 }
 0x4f8   : > { %1314 = vst [vmem:[%s195_s8 + $0x10] sm:$0xff] %v1310_v42 }
 0x4f9   : > { %1315 = vst [vmem:[%s195_s8 + $0x18] sm:$0xff] %v1311_v13 }
 0x4fa   : > { %1853 = shalt.err (!%p1850_p9)
}
 0x4fb   : > { %s1854_s6 = scalar_lea.hbm %s2729_s5, 512  ;;  %s1858_s28 = scalar_lea.hbm %s2778_s3, 1024 }
 0x4fc   : > { %p1855_p10 = scmp.ne.s32.totalorder %s2729_s5, %s1854_s6  ;;  %p1859_p13 = scmp.lt.u32.totalorder %s2729_s5, %s2778_s3 }
 0x4fd   : > { %p1860_p0 = scmp.lt.u32.totalorder %s1858_s28, %s1854_s6  ;;  %p1862_p2 = scmp.lt.u32.totalorder %s1854_s6, %s2729_s5 }
 0x4fe   : > { %p1856_p11 = pnand %p1855_p10, %p1979_p5 }
 0x4ff   : > { %p1861_p1 = por %p1860_p0, %p1859_p13 }
 0x500   : > { %p1857_p12 = pneg %p1856_p11 }
 0x501   : > { %p1863_p3 = por %p1862_p2, %p1861_p1 }
 0x503   : > { %p1864_p4 = pnand %p1863_p3, %p1857_p12 }
 0x505   : > { %1867 = shalt.err (!%p1864_p4)
}
 0x506   : > { %1569 = dma.vmem_to_hbm [thread:$0]  (%p1979_p5), %s2723_s9, 512, %s2729_s5, %s1381_s2, %s1910_s23, %s1910_s23, %s1911_s24  }
 0x507 PF: > { %p1580_p7 = scmp.ge.s32.totalorder %s1906_s20, 2  ;;  %s1430_s10 = sand.u32 1, %s1894_s17  }
 0x508   : > { %s1431_s29 = scalar_lea.sflag [#allocation4], %s1430_s10 }
 0x509   : > { %p1574_p8 = pnand %p1580_p7, %p1983_p6 }
 0x50b   : > { %1885 = dma.done.wait (!%p1574_p8), %s1431_s29, 512  }
 0x50c   : > { %1887 = vsyncadd (!%p1574_p8), %s1431_s29, 4294966784  ;;  %s1440_s26 = scalar_lea.sflag [#allocation6], %s1430_s10 }
 0x50d   : > { %1889 = dma.done.wait (!%p1574_p8), %s1440_s26, 8192  }
 0x50e   : > { %1891 = vsyncadd (!%p1574_p8), %s1440_s26, 4294959104  ;;  %p19_p5 = scmp.ge.s32.totalorder %s1966_s22, 4   ;;  %s2858_s17 = smov %s1898_s18 }
 0x50f   : > { %s2859_s18 = smov %s1902_s19  ;;  %s2860_s19 = smov %s1977_s25 }
 0x510   : > { %s2861_s20 = smov %s1966_s22  ;;  %21 = sbr.rel (!%p19_p5) target bundleno = 7 (0x7), region = 84 }
 0x517   :  { %1445 = vsyncpa [#allocation4], 1 }
 0x518   :  { %1447 = vsyncpa [#allocation4 + $0x1], 1 }
 0x519   :  { %1448 = vsyncpa [#allocation6], 1 }
 0x51a   :  { %1450 = vsyncpa [#allocation6 + $0x1], 1 }

</bundles_post_ra>
